<compile_context>
chip_gen: v7x
topology: tpu7x:2x2x1
jax: 0.10.0
libtpu: 0.0.40
codegen_flags: <defaults>
</compile_context>

<pallas_src>
import functools

import jax
import jax.numpy as jnp
from jax import lax
from jax.experimental import pallas as pl
from jax.experimental.pallas import tpu as pltpu


def _attention_kernel(x_ref, s_ref, o_ref, *, H, W, precision, cast_gates):
    TB, C, HW = x_ref.shape
    f32 = jnp.float32
    x = x_ref[...]                     # (TB, C, HW) in the input dtype
    S = s_ref[...]                     # (HW, H+W)   [one-hot row | one-hot col]

    # --- factored statistics: ONE fused MXU pass over the block ------------
    # NOTE: the leading-dim collapse may relayout when C is not a multiple of
    # the sublane tile; this is cheap relative to the block's HBM traffic.
    x2d = x.reshape(TB * C, HW)
    stats = lax.dot_general(           # (TB*C, H+W) = [row sums | col sums]
        x2d, S, (((1,), (0,)), ((), ())),
        precision=precision, preferred_element_type=f32,
    ).reshape(TB, C, H + W)

    # Per-channel gate: s_hw[b,c] = 2*sigmoid(mean_{H,W} x).
    mean_hw = jnp.sum(stats[:, :, :H], axis=-1) * (1.0 / (H * W))   # (TB, C)
    s_hw = 2.0 * jax.nn.sigmoid(mean_hw)

    # Per-row / per-col gates from the s_hw-weighted factored sums:
    #   s_cw[b,h] = 2*sigmoid( sum_c s_hw*rs / (C*W) )
    #   s_ch[b,w] = 2*sigmoid( sum_c s_hw*cs / (C*H) )
    sums = jnp.sum(s_hw[:, :, None] * stats, axis=1)                # (TB, H+W)
    col = lax.broadcasted_iota(jnp.int32, (1, H + W), 1)
    inv = jnp.where(col < H, 1.0 / (C * W), 1.0 / (C * H)).astype(f32)
    gates = 2.0 * jax.nn.sigmoid(sums * inv)                        # (TB, H+W)

    # --- expand gates back onto the flat HW axis: ONE fused MXU pass -------
    # g[b,p] = 1 + s_cw[b, p//W] + s_ch[b, p%W] (the add happens in the MXU).
    g = 1.0 + lax.dot_general(
        gates.astype(S.dtype), S, (((1,), (1,)), ((), ())),
        precision=precision, preferred_element_type=f32)            # (TB, HW)

    # --- single elementwise pass --------------------------------------------
    if cast_gates:     # sub-f32 inputs on v6e/v7x: bf16 VPU path, half vregs
        a = s_hw.astype(x.dtype)
        b = g.astype(x.dtype)
    else:              # f32 inputs, or bf16 on v5e (no bf16 VPU there)
        a = s_hw
        b = g
    out = x * a[:, :, None] * b[:, None, :]
    o_ref[...] = out.astype(o_ref.dtype)


def _segment_matrix(H, W, dtype):
    """S[p, :H] one-hot on h = p // W ;  S[p, H:] one-hot on w = p % W."""
    p = jnp.arange(H * W, dtype=jnp.int32)
    s_h = jax.nn.one_hot(p // W, H, dtype=dtype)
    s_w = jax.nn.one_hot(p % W, W, dtype=dtype)
    return jnp.concatenate([s_h, s_w], axis=1)          # (HW, H+W)


def _pick_batch_tile(B, per_sample_bytes, target_bytes):
    """Largest divisor of B with block <= target, preferring a grid length
    that keeps both v7x TensorCores busy (>=2, even, ideally >=4 steps)."""
    limit = max(1, min(B, target_bytes // max(per_sample_bytes, 1)))
    divisors = [d for d in range(1, B + 1) if B % d == 0]
    cands = [d for d in divisors if d <= limit] or [1]

    def score(d):
        g = B // d
        return (g >= 2 or B < 2, g % 2 == 0, g >= 4, d)

    return max(cands, key=score)


def _attention_jnp(x):
    # TODO(synk): replace with a two-pass (stats-accumulate + apply) HW-tiled
    # Pallas path for samples whose full (C, H*W) block does not fit in VMEM.
    xf = x.astype(jnp.float32)
    s_hw = 2.0 * jax.nn.sigmoid(jnp.mean(xf, axis=(2, 3), keepdims=True))
    x_hw = s_hw * xf
    s_cw = 2.0 * jax.nn.sigmoid(jnp.mean(x_hw, axis=(1, 3), keepdims=True))
    s_ch = 2.0 * jax.nn.sigmoid(jnp.mean(x_hw, axis=(1, 2), keepdims=True))
    return (x_hw * (1.0 + s_cw + s_ch)).astype(x.dtype)


def _on_v5e():
    try:
        kind = jax.devices()[0].device_kind.lower()
        return ("v5 lite" in kind) or ("v5e" in kind)
    except Exception:
        return False


def attention(x, *, target_block_bytes=4 * 1024 * 1024, donate_input=False):
    """ADFNet Attention forward.  x: (B, C, H, W), NCHW layout."""
    B, C, H, W = x.shape
    HW = H * W
    itemsize = x.dtype.itemsize
    per_sample = C * HW * itemsize
    s_bytes = HW * (H + W) * itemsize

    # Conservative VMEM budget check (v7x has 64 MiB physical): x/out blocks
    # are double-buffered and S may get two buffers too.
    if 4 * per_sample + 2 * s_bytes + (2 << 20) > 48 * 1024 * 1024:
        return _attention_jnp(x)

    x_flat = x.reshape(B, C, HW)                         # lane-dense last dim
    seg = _segment_matrix(H, W, x.dtype)                 # single dtype copy

    tb = _pick_batch_tile(B, per_sample, target_block_bytes)
    grid = (B // tb,)
    block_bytes = tb * per_sample
    vmem_limit = int(min(max(4 * block_bytes + 2 * s_bytes + (4 << 20),
                             16 * 1024 * 1024),
                         48 * 1024 * 1024))

    f32_in = x.dtype == jnp.float32
    kernel = functools.partial(
        _attention_kernel, H=H, W=W,
        precision=(lax.Precision.HIGHEST if f32_in else lax.Precision.DEFAULT),
        cast_gates=(not f32_in) and (not _on_v5e()))

    cost = pl.CostEstimate(
        flops=int(2 * B * C * HW * (H + W) + 2 * B * HW * (H + W)
                  + 3 * B * C * HW),
        transcendentals=int(B * (C + H + W)),
        bytes_accessed=int(2 * B * C * HW * itemsize + s_bytes))

    out_flat = pl.pallas_call(
        kernel,
        out_shape=jax.ShapeDtypeStruct((B, C, HW), x.dtype),
        grid_spec=pl.GridSpec(
            grid=grid,
            in_specs=[
                pl.BlockSpec((tb, C, HW), lambda b: (b, 0, 0)),
                # Constant block index -> S is DMA'd once and stays resident.
                pl.BlockSpec((HW, H + W), lambda b: (0, 0)),
            ],
            out_specs=pl.BlockSpec((tb, C, HW), lambda b: (b, 0, 0)),
        ),
        compiler_params=pltpu.CompilerParams(
            dimension_semantics=("parallel",),
            vmem_limit_bytes=vmem_limit,
        ),
        cost_estimate=cost,
        input_output_aliases={0: 0} if donate_input else {},
    )(x_flat, seg)
    return out_flat.reshape(B, C, H, W)


def _reference(x):
    x = x.astype(jnp.float32)
    s_hw = jax.nn.sigmoid(jnp.mean(x, axis=(2, 3), keepdims=True)) * 2
    x_hw = s_hw * x
    s_cw = jax.nn.sigmoid(jnp.mean(x_hw, axis=(1, 3), keepdims=True)) * 2
    x_cw = s_cw * x_hw
    s_ch = jax.nn.sigmoid(jnp.mean(x_hw, axis=(1, 2), keepdims=True)) * 2
    x_ch = s_ch * x_hw
    return x_cw + x_hw + x_ch


if __name__ == "__main__":
    key = jax.random.PRNGKey(0)
    B, C, H, W = 2, 4, 16, 16
    x = jax.random.normal(key, (B, C, H, W), dtype=jnp.float32)

    out = attention(x)
    jax.block_until_ready(out)

    ref = _reference(x)
    assert out.shape == (B, C, H, W)
    # HIGHEST-precision stats matmuls: only summation-order differences remain.
    assert jnp.allclose(out, ref, atol=1e-3, rtol=1e-3), float(
        jnp.max(jnp.abs(out - ref)))

    print("KERNEL_OK")
</pallas_src>

<mosaic_0001>
module attributes {stable_mosaic.version = 11 : i64} {
  func.func @_attention_kernel(%arg0: i32, %arg1: memref<1x4x256xf32, #tpu.memory_space<vmem>>, %arg2: memref<256x32xf32, #tpu.memory_space<vmem>>, %arg3: memref<1x4x256xf32, #tpu.memory_space<vmem>>) attributes {dimension_semantics = [#tpu.dimension_semantics<parallel>], iteration_bounds = array<i64: 2>, scalar_prefetch = 0 : i64, scratch_operands = 0 : i64, tpu.core_type = #tpu.core_type<tc>, window_params = [{transform_indices = @transform_0, window_bounds = array<i64: 1, 4, 256>}, {pipeline_mode = #tpu.pipeline_mode<synchronous>, transform_indices = @transform_1, window_bounds = array<i64: 256, 32>}, {transform_indices = @transform_2, window_bounds = array<i64: 1, 4, 256>}]} {
    %c0 = arith.constant 0 : index
    %c0_0 = arith.constant 0 : index
    %c0_1 = arith.constant 0 : index
    %0 = vector.load %arg1[%c0, %c0_0, %c0_1] : memref<1x4x256xf32, #tpu.memory_space<vmem>>, vector<1x4x256xf32>
    %c0_2 = arith.constant 0 : index
    %c0_3 = arith.constant 0 : index
    %1 = vector.load %arg2[%c0_2, %c0_3] : memref<256x32xf32, #tpu.memory_space<vmem>>, vector<256x32xf32>
    %2 = vector.shape_cast %0 : vector<1x4x256xf32> to vector<4x256xf32>
    %cst = arith.constant dense<0.000000e+00> : vector<4x32xf32>
    %3 = tpu.matmul %2, %1, %cst {dimension_numbers = #tpu.dot_dimension_numbers<[1], [0], [0], [1], [0, 0, 1, 1], [], []>, precision = #tpu.contract_precision<fp32>} : vector<4x256xf32>, vector<256x32xf32>, vector<4x32xf32> -> vector<4x32xf32>
    %4 = vector.shape_cast %3 : vector<4x32xf32> to vector<1x4x32xf32>
    %5 = vector.extract_strided_slice %4 {offsets = [0, 0, 0], sizes = [1, 4, 16], strides = [1, 1, 1]} : vector<1x4x32xf32> to vector<1x4x16xf32>
    %cst_4 = arith.constant dense<0.000000e+00> : vector<1x4xf32>
    %6 = vector.multi_reduction <add>, %5, %cst_4 [2] : vector<1x4x16xf32> to vector<1x4xf32>
    %cst_5 = arith.constant 3.906250e-03 : f32
    %7 = vector.broadcast %cst_5 : f32 to vector<1x4xf32>
    %8 = arith.mulf %6, %7 : vector<1x4xf32>
    %9 = arith.negf %8 : vector<1x4xf32>
    %10 = math.exp %9 : vector<1x4xf32>
    %cst_6 = arith.constant 1.000000e+00 : f32
    %11 = vector.broadcast %cst_6 : f32 to vector<1x4xf32>
    %12 = arith.addf %11, %10 : vector<1x4xf32>
    %13 = arith.divf %11, %12 : vector<1x4xf32>
    %cst_7 = arith.constant 2.000000e+00 : f32
    %14 = vector.broadcast %cst_7 : f32 to vector<1x4xf32>
    %15 = arith.mulf %14, %13 : vector<1x4xf32>
    %16 = vector.shape_cast %15 : vector<1x4xf32> to vector<1x4x1xf32>
    %17 = vector.broadcast %16 : vector<1x4x1xf32> to vector<1x4x32xf32>
    %18 = arith.mulf %17, %4 : vector<1x4x32xf32>
    %cst_8 = arith.constant dense<0.000000e+00> : vector<1x32xf32>
    %19 = vector.multi_reduction <add>, %18, %cst_8 [1] : vector<1x4x32xf32> to vector<1x32xf32>
    %20 = tpu.iota {dimensions = array<i32: 1>} : vector<1x32xi32>
    %c16_i32 = arith.constant 16 : i32
    %21 = vector.broadcast %c16_i32 : i32 to vector<1x32xi32>
    %22 = arith.cmpi slt, %20, %21 : vector<1x32xi32>
    %cst_9 = arith.constant 1.562500e-02 : f32
    %cst_10 = arith.constant 1.562500e-02 : f32
    %23 = vector.broadcast %cst_9 : f32 to vector<1x32xf32>
    %24 = vector.broadcast %cst_10 : f32 to vector<1x32xf32>
    %25 = arith.select %22, %23, %24 : vector<1x32xi1>, vector<1x32xf32>
    %26 = arith.mulf %19, %25 : vector<1x32xf32>
    %27 = arith.negf %26 : vector<1x32xf32>
    %28 = math.exp %27 : vector<1x32xf32>
    %cst_11 = arith.constant 1.000000e+00 : f32
    %29 = vector.broadcast %cst_11 : f32 to vector<1x32xf32>
    %30 = arith.addf %29, %28 : vector<1x32xf32>
    %31 = arith.divf %29, %30 : vector<1x32xf32>
    %cst_12 = arith.constant 2.000000e+00 : f32
    %32 = vector.broadcast %cst_12 : f32 to vector<1x32xf32>
    %33 = arith.mulf %32, %31 : vector<1x32xf32>
    %cst_13 = arith.constant dense<0.000000e+00> : vector<1x256xf32>
    %34 = tpu.matmul %33, %1, %cst_13 {dimension_numbers = #tpu.dot_dimension_numbers<[1], [1], [0], [0], [0, 0, 1, 0], [], []>, precision = #tpu.contract_precision<fp32>} : vector<1x32xf32>, vector<256x32xf32>, vector<1x256xf32> -> vector<1x256xf32>
    %cst_14 = arith.constant 1.000000e+00 : f32
    %35 = vector.broadcast %cst_14 : f32 to vector<1x256xf32>
    %36 = arith.addf %35, %34 : vector<1x256xf32>
    %37 = vector.shape_cast %15 : vector<1x4xf32> to vector<1x4x1xf32>
    %38 = vector.broadcast %37 : vector<1x4x1xf32> to vector<1x4x256xf32>
    %39 = arith.mulf %0, %38 : vector<1x4x256xf32>
    %40 = vector.shape_cast %36 : vector<1x256xf32> to vector<1x1x256xf32>
    %41 = vector.broadcast %40 : vector<1x1x256xf32> to vector<1x4x256xf32>
    %42 = arith.mulf %39, %41 : vector<1x4x256xf32>
    %c0_15 = arith.constant 0 : index
    %c0_16 = arith.constant 0 : index
    %c0_17 = arith.constant 0 : index
    %43 = vector.load %arg3[%c0_15, %c0_16, %c0_17] : memref<1x4x256xf32, #tpu.memory_space<vmem>>, vector<1x4x256xf32>
    tpu.vector_store %arg3[%c0_15, %c0_16, %c0_17], %42 {strides = array<i32>} : memref<1x4x256xf32, #tpu.memory_space<vmem>>, vector<1x4x256xf32>,
    return
  }
  func.func @transform_0(%arg0: i32) -> (i32, i32, i32) {
    %c0_i32 = arith.constant 0 : i32
    %c0_i32_0 = arith.constant 0 : i32
    %c0_i32_1 = arith.constant 0 : i32
    return %arg0, %c0_i32, %c0_i32_0 : i32, i32, i32
  }
  func.func @transform_1(%arg0: i32) -> (i32, i32) {
    %c0_i32 = arith.constant 0 : i32
    %c0_i32_0 = arith.constant 0 : i32
    %c0_i32_1 = arith.constant 0 : i32
    return %c0_i32, %c0_i32_0 : i32, i32
  }
  func.func @transform_2(%arg0: i32) -> (i32, i32, i32) {
    %c0_i32 = arith.constant 0 : i32
    %c0_i32_0 = arith.constant 0 : i32
    %c0_i32_1 = arith.constant 0 : i32
    return %arg0, %c0_i32, %c0_i32_0 : i32, i32, i32
  }
}

</mosaic_0001>

<bundles_post_ra>
// kernel: tpu_custom_call.1
= control target key start
LH: loop header
LB: loop body
LE: loop exit
PB: predicated region body
PF: predicated region fallthrough
CT: control target
= control target key end

     0   :  { %7 = vsyncpa [#allocation3], 0  ;;  %s4156_s0 = inlined_call_operand.vmem [shape: f32[2,4,256], index: 0, kind: input, shape index: {}]   ;;  %s4157_s1 = inlined_call_operand.vmem [shape: f32[256,32], index: 1, kind: input, shape index: {}]   ;;  %s4158_s2 = inlined_call_operand.hbm [shape: f32[2,4,256], index: 2, kind: output, shape index: {}]  }
   0x1   :  { %9 = vsyncpa [#allocation3 + $0x1], 0  ;;  %s3079_s9 = smov 0   ;;  %s3081_s10 = smov 0  }
   0x2   :  { %s3083_s11 = smov 0   ;;  %s3085_s12 = smov 0  }
   0x3 LB: > { %s3100_s13 = sadd.s32 4294967295, %s3060_s12   ;;  %s2122_s14 = sadd.s32 4294967294, %s3060_s12   ;;  %s3060_s12 = sphi %s3085_s12, %s4373_s12   ;;  %s3056_s11 = sphi %s3083_s11, %s4372_s11   ;;  %s3052_s10 = sphi %s3081_s10, %s4371_s10   ;;  %s3048_s9 = sphi %s3079_s9, %s4370_s9  }
   0x4   : > { %s3104_s15 = sadd.s32 1, %s3060_s12   ;;  %s69_s16 = sadd.s32 1, %s3056_s11 }
   0x5   : > { %s66_s17 = ssub.s32 %s3060_s12, %s3104_s15  ;;  %p79_p0 = scmp.ne.s32.totalorder %s3056_s11, %s3052_s10 }
   0x6   : > { %p67_p1 = scmp.eq.s32.totalorder %s66_s17, 0  ;;  %p80_p2 = scmp.eq.s32.totalorder %s3100_s13, 1 }
   0x7   : > { %p85_p3 = scmp.ne.s32.totalorder %s3052_s10, %s3048_s9  ;;  %p86_p4 = scmp.eq.s32.totalorder %s2122_s14, 1 }
   0x8   : > { %s3115_s18 = scalar_select %p67_p1, %s3056_s11, %s69_s16  }
   0x9   : > { %p3117_p5 = por %p80_p2, %p79_p0  ;;  %p3121_p6 = por %p86_p4, %p85_p3 }
   0xa   : > { %p2125_p7 = scmp.ge.s32.totalorder %s3060_s12, 1  ;;  %p115_p8 = scmp.lt.s32.totalorder %s3060_s12, 3 }
   0xc   : > { %p116_p9 = pnand %p2125_p7, %p115_p8 }
   0xe   : > { %119 = sbr.rel (%p116_p9) target bundleno = 958 (0x3be), region = 28 }
  0x15   : > { %v3130_v0 = vld [vmem:[%s4157_s1 + $0x80] sm:$0xff]  ;;  %v3135_v1 = vld [vmem:[%s4157_s1 + $0x88] sm:$0xff]  ;;  %v3153_v7 = vld [vmem:[%s4157_s1 + $0x90] sm:$0xff]  ;;  %p137_p10 = scmp.lt.s32.totalorder %s3100_s13, 1  ;;  %vm1040_vm0 = vcmask 125952   ;;  %vm1069_vm1 = vcmask 261120  }
  0x16   : > { %4245 = vst [vmem:[#allocation5_spill] sm:$0xff] %v3130_v0  ;;  %4246 = vst [vmem:[#allocation6_spill] sm:$0xff] %v3135_v1  ;;  %v3140_v2 = vld [vmem:[%s4157_s1] sm:$0xff]  ;;  %v227_v3 = vand.u32 4294901760, %v3130_v0  ;;  %v230_v4 = vand.u32 4294901760, %v3135_v1  ;;  %v3147_v5 = vld [vmem:[%s4157_s1 + $0x8] sm:$0xff] }
  0x17   : > { %4247 = vst [vmem:[#allocation7_spill] sm:$0xff] %v3140_v2  ;;  %4248 = vst [vmem:[#allocation8_spill] sm:$0xff] %v3147_v5  ;;  %v179_v6 = vand.u32 4294901760, %v3140_v2  ;;  %v3158_v8 = vld [vmem:[%s4157_s1 + $0x98] sm:$0xff]  ;;  %v182_v9 = vand.u32 4294901760, %v3147_v5  ;;  %v233_v10 = vand.u32 4294901760, %v3153_v7 }
  0x18   : > { %4249 = vst [vmem:[#allocation9_spill] sm:$0xff] %v3153_v7  ;;  %4250 = vst [vmem:[#allocation10_spill] sm:$0xff] %v3158_v8  ;;  %v236_v11 = vand.u32 4294901760, %v3158_v8  ;;  %v3166_v12 = vld [vmem:[%s4157_s1 + $0x10] sm:$0xff]  ;;  %v3171_v13 = vld [vmem:[%s4157_s1 + $0x18] sm:$0xff]  ;;  %v3173_v14 = vpack.c.bf16 %v230_v4, %v227_v3  ;;  %v3223_v31 = vsub.f32 %v3130_v0, %v227_v3  ;;  %v3226_v32 = vsub.f32 %v3135_v1, %v230_v4  ;;  %s3452_s14 = scalar_select %p137_p10, %s3100_s13, 1 }
  0x19   : > { %4251 = vst [vmem:[#allocation11_spill] sm:$0xff] %v3166_v12  ;;  %4252 = vst [vmem:[#allocation12_spill] sm:$0xff] %v3171_v13  ;;  %v3176_v15 = vsub.f32 %v3140_v2, %v179_v6  ;;  %v185_v16 = vand.u32 4294901760, %v3166_v12  ;;  %v188_v17 = vand.u32 4294901760, %v3171_v13  ;;  %v3183_v18 = vld [vmem:[%s4157_s1 + $0xa0] sm:$0xff]  ;;  %v3188_v19 = vld [vmem:[%s4157_s1 + $0xa8] sm:$0xff]  ;;  %v3190_v20 = vpack.c.bf16 %v182_v9, %v179_v6 }
  0x1a   : > { %4253 = vst [vmem:[#allocation13_spill] sm:$0xff] %v3183_v18  ;;  %4254 = vst [vmem:[#allocation14_spill] sm:$0xff] %v3188_v19  ;;  %v3193_v21 = vsub.f32 %v3147_v5, %v182_v9  ;;  %v3195_v22 = vpack.c.bf16 %v236_v11, %v233_v10  ;;  %v3200_v23 = vld [vmem:[%s4157_s1 + $0x20] sm:$0xff]  ;;  %v3205_v24 = vld [vmem:[%s4157_s1 + $0x28] sm:$0xff]  ;;  %2553 = vmatprep.subr.bf16.mxu0 %v3173_v14  ;;  %v3209_v25 = vsub.f32 %v3153_v7, %v233_v10  ;;  %s2136_s25 = sshll.u32 %s3452_s14, 3  ;;  %vm1053_vm2 = vcmask 257024  }
  0x1b   : > { %4255 = vst [vmem:[#allocation15_spill] sm:$0xff] %v3200_v23  ;;  %4256 = vst [vmem:[#allocation16_spill] sm:$0xff] %v3205_v24  ;;  %v3212_v26 = vsub.f32 %v3158_v8, %v236_v11  ;;  %v3214_v27 = vpack.c.bf16 %v188_v17, %v185_v16  ;;  %v3217_v28 = vsub.f32 %v3166_v12, %v185_v16  ;;  %2555 = vmatpush3.bf16.msra.mxu0 %v3190_v20  ;;  %v3236_v37 = vld [vmem:[%s4157_s1 + $0xb0] sm:$0xff]  ;;  %v3250_v42 = vld [vmem:[%s4157_s1 + $0xb8] sm:$0xff]  ;;  %s3529_s4 = scalar_lea.vmem %s4156_s0, %s2136_s25  ;;  %s134_s5 = sand.u32 1, %s3052_s10  }
  0x1c   : > { %v239_v29 = vand.u32 4294901760, %v3183_v18  ;;  %v242_v30 = vand.u32 4294901760, %v3188_v19  ;;  %2557 = vmatprep.subr.bf16.mxu0 %v3195_v22  ;;  %v191_v33 = vand.u32 4294901760, %v3200_v23  ;;  %v194_v34 = vand.u32 4294901760, %v3205_v24  ;;  %4257 = vst [vmem:[#allocation17_spill] sm:$0xff] %v3236_v37  ;;  %4258 = vst [vmem:[#allocation18_spill] sm:$0xff] %v3250_v42 }
  0x1d   : > { %v4166_v35 = vand.u32 4294901760, %v3176_v15  ;;  %v4165_v36 = vand.u32 4294901760, %v3193_v21  ;;  %v3239_v38 = vsub.f32 %v3171_v13, %v188_v17  ;;  %v4168_v41 = vand.u32 4294901760, %v3223_v31  ;;  %v3282_v55 = vld [vmem:[%s4157_s1 + $0x30] sm:$0xff]  ;;  %v3287_v56 = vld [vmem:[%s4157_s1 + $0x38] sm:$0xff]  ;;  %v3309_v11 = vld [vmem:[%s4157_s1 + $0xc0] sm:$0xff] }
  0x1e   : > { %v3241_v39 = vpack.c.bf16 %v242_v30, %v239_v29  ;;  %v3244_v40 = vsub.f32 %v3183_v18, %v239_v29  ;;  %v3253_v43 = vsub.f32 %v3188_v19, %v242_v30  ;;  %v4167_v44 = vand.u32 4294901760, %v3226_v32  ;;  %4259 = vst [vmem:[#allocation19_spill] sm:$0xff] %v3282_v55  ;;  %4260 = vst [vmem:[#allocation20_spill] sm:$0xff] %v3287_v56  ;;  %v3314_v16 = vld [vmem:[%s4157_s1 + $0xc8] sm:$0xff]  ;;  %s2126_s6 = sshll.u32 %s134_s5, 3  ;;  %s2137_s7 = sshll.u32 %s3100_s13, 7 }
  0x1f   : > { %v3256_v45 = vpack.c.bf16 %v194_v34, %v191_v33  ;;  %v3259_v46 = vsub.f32 %v3200_v23, %v191_v33  ;;  %2559 = vmatpush3.bf16.msra.mxu0 %v3214_v27  ;;  %v406_v47 = vsub.f32 %v3223_v31, %v4168_v41  ;;  %v294_v48 = vsub.f32 %v3176_v15, %v4166_v35  ;;  %s136_s8 = scalar_lea.vmem [#allocation2], %s2126_s6  ;;  %s4114_s21 = scalar_lea.hbm %s4158_s2, %s2137_s7 }
  0x20   : > { %v301_v49 = vsub.f32 %v3193_v21, %v4165_v36  ;;  %v245_v50 = vand.u32 4294901760, %v3236_v37  ;;  %2561 = vmatprep.subr.bf16.mxu0 %v3241_v39  ;;  %v413_v51 = vsub.f32 %v3226_v32, %v4167_v44  ;;  %v248_v52 = vand.u32 4294901760, %v3250_v42  ;;  %4261 = vst [vmem:[#allocation21_spill] sm:$0xff] %v3309_v11  ;;  %4262 = vst [vmem:[#allocation22_spill] sm:$0xff] %v3314_v16  ;;  %s2063_s14 = sshll.u32 %s136_s8, 4  ;;  %s2049_s22 = scalar_lea.sflag [#allocation3], %s134_s5  ;;  %s4116_s14 = int_to_ptr.vmem [resolvable:$true] %s2063_s14 }
  0x21   : > { %v4162_v53 = vand.u32 4294901760, %v3209_v25  ;;  %v4161_v54 = vand.u32 4294901760, %v3212_v26  ;;  %v407_v57 = vand.u32 4294901760, %v406_v47  ;;  %v3290_v58 = vsub.f32 %v3205_v24, %v194_v34  ;;  %v3322_v34 = vld [vmem:[%s4157_s1 + $0x40] sm:$0xff]  ;;  %s2998_s23 = scalar_lea.vmem %s4116_s14, 128  ;;  %s3063_s13 = smov [#allocation2]  }
  0x22   : > { %v295_v59 = vand.u32 4294901760, %v294_v48  ;;  %v302_v60 = vand.u32 4294901760, %v301_v49  ;;  %v414_v61 = vand.u32 4294901760, %v413_v51  ;;  %v3292_v62 = vpack.c.bf16 %v248_v52, %v245_v50  ;;  %4263 = vst [vmem:[#allocation23_spill] sm:$0xff] %v3322_v34  ;;  %p2999_p11 = scmp.ne.s32.totalorder %s4116_s14, %s2998_s23  ;;  %s3002_s24 = sshll.u32 %s3063_s13, 4  ;;  %s3003_s24 = int_to_ptr.vmem [resolvable:$false] %s3002_s24 }
  0x23   : > { %v3295_v63 = vsub.f32 %v3236_v37, %v245_v50  ;;  %v420_v3 = vsub.f32 %v3209_v25, %v4162_v53  ;;  %2563 = vmatpush3.bf16.msra.mxu0 %v3256_v45  ;;  %v427_v6 = vsub.f32 %v3212_v26, %v4161_v54  ;;  %v197_v9 = vand.u32 4294901760, %v3282_v55  ;;  %s3004_s25 = scalar_lea.vmem %s3003_s24, 256  ;;  %p3005_p0 = scmp.lt.s32.totalorder %s4116_s14, %s3003_s24 }
  0x24   : > { %v2586_v4 = vpack.c.bf16 %v302_v60, %v295_v59  ;;  %v200_v10 = vand.u32 4294901760, %v3287_v56  ;;  %v2584_v17 = vpack.c.bf16 %v414_v61, %v407_v57  ;;  %2565 = vmatprep.subr.bf16.mxu0 %v3292_v62  ;;  %v4160_v30 = vand.u32 4294901760, %v3217_v28  ;;  %v3343_v60 = vld [vmem:[%s4157_s1 + $0x48] sm:$0xff]  ;;  %p3000_p12 = pnand %p2999_p11, %p3117_p5  ;;  %p3006_p1 = scmp.lt.s32.totalorder %s3004_s25, %s2998_s23 }
  0x25   : > { %v421_v29 = vand.u32 4294901760, %v420_v3  ;;  %v4159_v33 = vand.u32 4294901760, %v3239_v38  ;;  %v3325_v47 = vsub.f32 %v3250_v42, %v248_v52  ;;  %v428_v48 = vand.u32 4294901760, %v427_v6  ;;  %4264 = vst [vmem:[#allocation24_spill] sm:$0xff] %v3343_v60 }
  0x26   : > { %v3327_v49 = vpack.c.bf16 %v200_v10, %v197_v9  ;;  %v3330_v50 = vsub.f32 %v3282_v55, %v197_v9  ;;  %2585 = vmatprep.subr.bf16.mxu1 %v2584_v17  ;;  %v308_v51 = vsub.f32 %v3217_v28, %v4160_v30  ;;  %v251_v59 = vand.u32 4294901760, %v3309_v11  ;;  %p3001_p13 = pneg %p3000_p12  ;;  %p3007_p2 = por %p3006_p1, %p3005_p0 }
  0x27   : > { %v315_v57 = vsub.f32 %v3239_v38, %v4159_v33  ;;  %v254_v52 = vand.u32 4294901760, %v3314_v16  ;;  %2587 = vmatpush3.bf16.msra.mxu1 %v2586_v4  ;;  %v2588_v61 = vpack.c.bf16 %v428_v48, %v421_v29  ;;  %v4164_v3 = vand.u32 4294901760, %v3244_v40 }
  0x28   : > { %2567 = vmatpush3.bf16.msra.mxu0 %v3327_v49  ;;  %v4163_v6 = vand.u32 4294901760, %v3253_v43  ;;  %v203_v9 = vand.u32 4294901760, %v3322_v34  ;;  %v3350_v17 = vsub.f32 %v3287_v56, %v200_v10  ;;  %v309_v33 = vand.u32 4294901760, %v308_v51  ;;  %v3367_v10 = vld [vmem:[%s4157_s1 + $0xd0] sm:$0xff]  ;;  %v3372_v51 = vld [vmem:[%s4157_s1 + $0xd8] sm:$0xff]  ;;  %p3008_p3 = pnand %p3007_p2, %p3001_p13 }
  0x29   : > { %v316_v30 = vand.u32 4294901760, %v315_v57  ;;  %v3352_v54 = vpack.c.bf16 %v254_v52, %v251_v59  ;;  %2589 = vmatprep.subr.bf16.mxu1 %v2588_v61  ;;  %v3355_v53 = vsub.f32 %v3309_v11, %v251_v59  ;;  %v434_v4 = vsub.f32 %v3244_v40, %v4164_v3  ;;  %4265 = vst [vmem:[#allocation25_spill] sm:$0xff] %v3367_v10  ;;  %v3383_v3 = vld [vmem:[%s4157_s1 + $0x50] sm:$0xff] }
  0x2a   : > { %v441_v29 = vsub.f32 %v3253_v43, %v4163_v6  ;;  %v206_v48 = vand.u32 4294901760, %v3343_v60  ;;  %4266 = vst [vmem:[#allocation26_spill] sm:$0xff] %v3372_v51  ;;  %v3376_v59 = vsub.f32 %v3314_v16, %v254_v52  ;;  %v4170_v61 = vand.u32 4294901760, %v3259_v46  ;;  %4267 = vst [vmem:[#allocation27_spill] sm:$0xff] %v3383_v3 }
  0x2b   : > { %v2590_v57 = vpack.c.bf16 %v316_v30, %v309_v33  ;;  %2569 = vmatprep.subr.bf16.mxu0 %v3352_v54  ;;  %v4171_v6 = vand.u32 4294901760, %v3290_v58  ;;  %v435_v36 = vand.u32 4294901760, %v434_v4  ;;  %v3388_v30 = vsub.f32 %v3322_v34, %v203_v9  ;;  %v3401_v4 = vld [vmem:[%s4157_s1 + $0x58] sm:$0xff] }
  0x2c   : > { %v442_v35 = vand.u32 4294901760, %v441_v29  ;;  %v3385_v44 = vpack.c.bf16 %v206_v48, %v203_v9  ;;  %v322_v33 = vsub.f32 %v3259_v46, %v4170_v61  ;;  %v257_v41 = vand.u32 4294901760, %v3367_v10  ;;  %4268 = vst [vmem:[#allocation28_spill] sm:$0xff] %v3401_v4 }
  0x2d   : > { %2591 = vmatpush3.bf16.msra.mxu1 %v2590_v57  ;;  %v329_v52 = vsub.f32 %v3290_v58, %v4171_v6  ;;  %v260_v16 = vand.u32 4294901760, %v3372_v51  ;;  %v4177_v29 = vand.u32 4294901760, %v3295_v63  ;;  %v4176_v57 = vand.u32 4294901760, %v3325_v47 }
  0x2e   : > { %v2592_v9 = vpack.c.bf16 %v442_v35, %v435_v36  ;;  %2571 = vmatpush3.bf16.msra.mxu0 %v3385_v44  ;;  %v209_v61 = vand.u32 4294901760, %v3383_v3  ;;  %v3409_v6 = vsub.f32 %v3343_v60, %v206_v48  ;;  %v323_v34 = vand.u32 4294901760, %v322_v33  ;;  %v3426_v33 = vld [vmem:[%s4157_s1 + $0xe0] sm:$0xff] }
  0x2f   : > { %v330_v11 = vand.u32 4294901760, %v329_v52  ;;  %v3411_v56 = vpack.c.bf16 %v260_v16, %v257_v41  ;;  %v3414_v55 = vsub.f32 %v3367_v10, %v257_v41  ;;  %v448_v35 = vsub.f32 %v3295_v63, %v4177_v29  ;;  %4269 = vst [vmem:[#allocation29_spill] sm:$0xff] %v3426_v33  ;;  %v3431_v41 = vld [vmem:[%s4157_s1 + $0xe8] sm:$0xff]  ;;  %v3442_v10 = vld [vmem:[%s4157_s1 + $0x60] sm:$0xff] }
  0x30   : > { %2593 = vmatprep.subr.bf16.mxu1 %v2592_v9  ;;  %v455_v36 = vsub.f32 %v3325_v47, %v4176_v57  ;;  %v212_v48 = vand.u32 4294901760, %v3401_v4  ;;  %4270 = vst [vmem:[#allocation30_spill] sm:$0xff] %v3431_v41  ;;  %v3435_v9 = vsub.f32 %v3372_v51, %v260_v16  ;;  %v4183_v57 = vand.u32 4294901760, %v3330_v50  ;;  %4271 = vst [vmem:[#allocation31_spill] sm:$0xff] %v3442_v10 }
  0x31   : > { %v2594_v52 = vpack.c.bf16 %v330_v11, %v323_v34  ;;  %2573 = vmatprep.subr.bf16.mxu0 %v3411_v56  ;;  %v4185_v29 = vand.u32 4294901760, %v3350_v17  ;;  %v449_v60 = vand.u32 4294901760, %v448_v35  ;;  %v3447_v11 = vsub.f32 %v3383_v3, %v209_v61 }
  0x32   : > { %v456_v42 = vand.u32 4294901760, %v455_v36  ;;  %v3444_v37 = vpack.c.bf16 %v212_v48, %v209_v61  ;;  %v336_v16 = vsub.f32 %v3330_v50, %v4183_v57  ;;  %v263_v35 = vand.u32 4294901760, %v3426_v33  ;;  %v3465_v61 = vld [vmem:[%s4157_s1 + $0x68] sm:$0xff] }
  0x33   : > { %2595 = vmatpush3.bf16.msra.mxu1 %v2594_v52  ;;  %v343_v34 = vsub.f32 %v3350_v17, %v4185_v29  ;;  %v266_v36 = vand.u32 4294901760, %v3431_v41  ;;  %4272 = vst [vmem:[#allocation32_spill] sm:$0xff] %v3465_v61  ;;  %v4192_v52 = vand.u32 4294901760, %v3355_v53  ;;  %v4191_v57 = vand.u32 4294901760, %v3376_v59 }
  0x34   : > { %v2596_v3 = vpack.c.bf16 %v456_v42, %v449_v60  ;;  %2575 = vmatpush3.bf16.msra.mxu0 %v3444_v37  ;;  %v215_v51 = vand.u32 4294901760, %v3442_v10  ;;  %v3472_v29 = vsub.f32 %v3401_v4, %v212_v48  ;;  %v337_v24 = vand.u32 4294901760, %v336_v16  ;;  %v3489_v48 = vld [vmem:[%s4157_s1 + $0xf0] sm:$0xff] }
  0x35   : > { %v344_v23 = vand.u32 4294901760, %v343_v34  ;;  %v3474_v19 = vpack.c.bf16 %v266_v36, %v263_v35  ;;  %v3477_v18 = vsub.f32 %v3426_v33, %v263_v35  ;;  %v462_v42 = vsub.f32 %v3355_v53, %v4192_v52  ;;  %4274 = vst [vmem:[#allocation34_spill] sm:$0xff] %v3489_v48  ;;  %v3506_v52 = vld [vmem:[%s4157_s1 + $0x70] sm:$0xff] }
  0x36   : > { %2597 = vmatprep.subr.bf16.mxu1 %v2596_v3  ;;  %v469_v60 = vsub.f32 %v3376_v59, %v4191_v57  ;;  %v218_v13 = vand.u32 4294901760, %v3465_v61  ;;  %v3494_v3 = vld [vmem:[%s4157_s1 + $0xf8] sm:$0xff]  ;;  %v3499_v34 = vsub.f32 %v3431_v41, %v266_v36  ;;  %v4199_v35 = vand.u32 4294901760, %v3388_v30  ;;  %4276 = vst [vmem:[#allocation36_spill] sm:$0xff] %v3506_v52 }
  0x37   : > { %4273 = vst [vmem:[#allocation33_spill] sm:$0xff] %v3474_v19  ;;  %4275 = vst [vmem:[#allocation35_spill] sm:$0xff] %v3494_v3  ;;  %v2598_v16 = vpack.c.bf16 %v344_v23, %v337_v24  ;;  %2577 = vmatprep.subr.bf16.mxu0 %v3474_v19  ;;  %v4198_v57 = vand.u32 4294901760, %v3409_v6  ;;  %v463_v33 = vand.u32 4294901760, %v462_v42  ;;  %v3511_v23 = vsub.f32 %v3442_v10, %v215_v51  ;;  %v3524_v42 = vld [vmem:[%s4157_s1 + $0x78] sm:$0xff] }
  0x38   : > { %v470_v4 = vand.u32 4294901760, %v469_v60  ;;  %v3508_v12 = vpack.c.bf16 %v218_v13, %v215_v51  ;;  %v350_v24 = vsub.f32 %v3388_v30, %v4199_v35  ;;  %v269_v41 = vand.u32 4294901760, %v3489_v48  ;;  %4278 = vst [vmem:[#allocation38_spill] sm:$0xff] %v3524_v42 }
  0x39   : > { %2599 = vmatpush3.bf16.msra.mxu1 %v2598_v16  ;;  %v357_v36 = vsub.f32 %v3409_v6, %v4198_v57  ;;  %v272_v8 = vand.u32 4294901760, %v3494_v3  ;;  %v4207_v60 = vand.u32 4294901760, %v3414_v55  ;;  %v4209_v16 = vand.u32 4294901760, %v3435_v9 }
  0x3a   : > { %4277 = vst [vmem:[#allocation37_spill] sm:$0xff] %v3508_v12  ;;  %v2600_v51 = vpack.c.bf16 %v470_v4, %v463_v33  ;;  %2579 = vmatpush3.bf16.msra.mxu0 %v3508_v12  ;;  %v221_v57 = vand.u32 4294901760, %v3506_v52  ;;  %v3536_v35 = vsub.f32 %v3465_v61, %v218_v13  ;;  %v351_v10 = vand.u32 4294901760, %v350_v24  ;;  %v142_v13 = vld [vmem:[%s3529_s4] sm:$0xff] }
  0x3b   : > { %v358_v7 = vand.u32 4294901760, %v357_v36  ;;  %v3538_v5 = vpack.c.bf16 %v272_v8, %v269_v41  ;;  %v3541_v2 = vsub.f32 %v3489_v48, %v269_v41  ;;  %v476_v4 = vsub.f32 %v3414_v55, %v4207_v60 }
  0x3c   : > { %2601 = vmatprep.subr.bf16.mxu1 %v2600_v51  ;;  %v483_v33 = vsub.f32 %v3435_v9, %v4209_v16  ;;  %v224_v1 = vand.u32 4294901760, %v3524_v42  ;;  %v3553_v24 = vsub.f32 %v3494_v3, %v272_v8  ;;  %v4212_v41 = vand.u32 4294901760, %v3447_v11 }
  0x3d   : > { %4279 = vst [vmem:[#allocation39_spill] sm:$0xff] %v3538_v5  ;;  %v2602_v61 = vpack.c.bf16 %v358_v7, %v351_v10  ;;  %2581 = vmatprep.subr.bf16.mxu0 %v3538_v5  ;;  %v4215_v36 = vand.u32 4294901760, %v3472_v29  ;;  %v477_v51 = vand.u32 4294901760, %v476_v4  ;;  %v3560_v0 = vsub.f32 %v3506_v52, %v221_v57 }
  0x3e   : > { %v484_v48 = vand.u32 4294901760, %v483_v33  ;;  %v3557_v60 = vpack.c.bf16 %v224_v1, %v221_v57  ;;  %v364_v7 = vsub.f32 %v3447_v11, %v4212_v41  ;;  %v176_v10 = vcombine.high %v142_v13, %v142_v13 }
  0x3f   : > { %2603 = vmatpush3.bf16.msra.mxu1 %v2602_v61  ;;  %v371_v8 = vsub.f32 %v3472_v29, %v4215_v36  ;;  %v3568_v16 = vand.u32 4294901760, %v142_v13  ;;  %v4218_v4 = vand.u32 4294901760, %v3477_v18  ;;  %v4221_v57 = vand.u32 4294901760, %v3499_v34 }
  0x40   : > { %4280 = vst [vmem:[#allocation40_spill] sm:$0xff] %v3557_v60  ;;  %v2604_v3 = vpack.c.bf16 %v484_v48, %v477_v51  ;;  %2583 = vmatpush3.bf16.msra.mxu0 %v3557_v60  ;;  %v2616_v61 = vpack.c.bf16 %v3226_v32, %v3223_v31  ;;  %v365_v33 = vand.u32 4294901760, %v364_v7  ;;  %v3575_v41 = vand.u32 4294901760, %v176_v10 }
  0x41   : > { %v372_v52 = vand.u32 4294901760, %v371_v8  ;;  %v3578_v5 = vsub.f32 %v142_v13, %v3568_v16  ;;  %v490_v48 = vsub.f32 %v3477_v18, %v4218_v4  ;;  %v497_v51 = vsub.f32 %v3499_v34, %v4221_v57 }
  0x42   : > { %4281 = vst [vmem:[#allocation41_spill] sm:$0xff] %v3575_v41  ;;  %2605 = vmatprep.subr.bf16.mxu1 %v2604_v3  ;;  %2617 = vmatprep.subr.bf16.mxu0 %v2616_v61  ;;  %v4223_v36 = vand.u32 4294901760, %v3511_v23  ;;  %v4224_v7 = vand.u32 4294901760, %v3536_v35  ;;  %v3589_v8 = vsub.f32 %v3524_v42, %v224_v1  ;;  %v3592_v13 = vsub.f32 %v176_v10, %v3575_v41 }
  0x43   : > { %4282 = vst [vmem:[#allocation42_spill] sm:$0xff] %v3578_v5  ;;  %v2606_v60 = vpack.c.bf16 %v372_v52, %v365_v33  ;;  %v4227_v3 = vand.u32 4294901760, %v3578_v5  ;;  %515 = vmatprep.mubr.f32.mxu1 %v3575_v41  ;;  %v491_v4 = vand.u32 4294901760, %v490_v48  ;;  %v498_v12 = vand.u32 4294901760, %v497_v51 }
  0x44   : > { %v378_v61 = vsub.f32 %v3511_v23, %v4223_v36  ;;  %v385_v57 = vsub.f32 %v3536_v35, %v4224_v7  ;;  %v276_v1 = vand.u32 4294901760, %v3592_v13  ;;  %v4232_v10 = vand.u32 4294901760, %v3541_v2 }
  0x45   : > { %2607 = vmatpush3.bf16.msra.mxu1 %v2606_v60  ;;  %v283_v52 = vsub.f32 %v3578_v5, %v4227_v3  ;;  %v510_v33 = vand.u32 4294901760, %v3553_v24  ;;  %v2608_v48 = vpack.c.bf16 %v498_v12, %v491_v4  ;;  %v4233_v5 = vand.u32 4294901760, %v3560_v0 }
  0x46   : > { %v379_v51 = vand.u32 4294901760, %v378_v61  ;;  %v386_v42 = vand.u32 4294901760, %v385_v57  ;;  %v277_v36 = vsub.f32 %v3592_v13, %v276_v1  ;;  %v504_v7 = vsub.f32 %v3541_v2, %v4232_v10 }
  0x47   : > { %v511_v60 = vsub.f32 %v3553_v24, %v510_v33  ;;  %2609 = vmatprep.subr.bf16.mxu1 %v2608_v48  ;;  %v284_v41 = vand.u32 4294901760, %v283_v52  ;;  %v398_v19 = vand.u32 4294901760, %v3589_v8  ;;  %v2618_v4 = vpack.c.bf16 %v3193_v21, %v3176_v15 }
  0x48   : > { %v2610_v3 = vpack.c.bf16 %v386_v42, %v379_v51  ;;  %v278_v12 = vand.u32 4294901760, %v277_v36  ;;  %v505_v57 = vand.u32 4294901760, %v504_v7  ;;  %v2620_v10 = vpack.c.bf16 %v3212_v26, %v3209_v25 }
  0x49   : > { %v512_v61 = vand.u32 4294901760, %v511_v60  ;;  %v392_v48 = vsub.f32 %v3560_v0, %v4233_v5  ;;  %v399_v42 = vsub.f32 %v3589_v8, %v398_v19  ;;  %v2622_v7 = vpack.c.bf16 %v3239_v38, %v3217_v28 }
  0x4a   : > { %2611 = vmatpush3.bf16.msra.mxu1 %v2610_v3  ;;  %279 = vmatprep.mubr.f32.mxu0 %v278_v12  ;;  %v2624_v3 = vpack.c.bf16 %v3253_v43, %v3244_v40  ;;  %v2626_v5 = vpack.c.bf16 %v3290_v58, %v3259_v46  ;;  %v4283_v12 = vand.u32 4294901760, %v3223_v31  ;;  %v4291_v31 = vand.u32 4294901760, %v3244_v40 }
  0x4b   : > { %v2612_v52 = vpack.c.bf16 %v512_v61, %v505_v57  ;;  %285 = vmatmul.mubr.f32.vlgmr.msra.gmra.mrb[0].mxu0 %v284_v41  ;;  %v393_v36 = vand.u32 4294901760, %v392_v48  ;;  %v400_v51 = vand.u32 4294901760, %v399_v42  ;;  %v4284_v41 = vand.u32 4294901760, %v3226_v32 }
  0x4c   : > { %2619 = vmatpush3.bf16.msra.mxu0 %v2618_v4  ;;  %652 = vmatprep.mubr.f32.mxu0 %v3592_v13  ;;  %v4285_v4 = vand.u32 4294901760, %v3176_v15  ;;  %v4286_v61 = vand.u32 4294901760, %v3193_v21  ;;  %v4287_v42 = vand.u32 4294901760, %v3209_v25  ;;  %v4292_v32 = vand.u32 4294901760, %v3253_v43 }
  0x4d   : > { %2613 = vmatprep.subr.bf16.mxu1 %v2612_v52  ;;  %2621 = vmatprep.subr.bf16.mxu0 %v2620_v10  ;;  %v2614_v60 = vpack.c.bf16 %v400_v51, %v393_v36  ;;  %v2680_v57 = vpack.c.bf16 %v4284_v41, %v4283_v12  ;;  %v4288_v10 = vand.u32 4294901760, %v3212_v26  ;;  %v4289_v36 = vand.u32 4294901760, %v3217_v28 }
  0x4e   : > { %v2682_v48 = vpack.c.bf16 %v4286_v61, %v4285_v4  ;;  %v4290_v51 = vand.u32 4294901760, %v3239_v38  ;;  %v2688_v12 = vpack.c.bf16 %v4292_v32, %v4291_v31  ;;  %v4293_v15 = vand.u32 4294901760, %v3259_v46 }
  0x4f   : > { %v2684_v52 = vpack.c.bf16 %v4288_v10, %v4287_v42  ;;  %2615 = vmatpush3.bf16.msra.mxu1 %v2614_v60  ;;  %v4294_v21 = vand.u32 4294901760, %v3290_v58  ;;  %v4295_v25 = vand.u32 4294901760, %v3295_v63  ;;  %v4296_v26 = vand.u32 4294901760, %v3325_v47 }
  0x50   : > { %v2686_v13 = vpack.c.bf16 %v4290_v51, %v4289_v36  ;;  %v4297_v28 = vand.u32 4294901760, %v3330_v50  ;;  %v4298_v38 = vand.u32 4294901760, %v3350_v17  ;;  %v4299_v40 = vand.u32 4294901760, %v3355_v53  ;;  %2623 = vmatpush3.bf16.msra.mxu0 %v2622_v7  ;;  %2649 = vmatprep.subr.bf16.mxu1 %v3173_v14 }
  0x51   : > { %v2690_v41 = vpack.c.bf16 %v4294_v21, %v4293_v15  ;;  %v2692_v4 = vpack.c.bf16 %v4296_v26, %v4295_v25  ;;  %v4300_v43 = vand.u32 4294901760, %v3376_v59  ;;  %v4301_v46 = vand.u32 4294901760, %v3388_v30  ;;  %2625 = vmatprep.subr.bf16.mxu0 %v2624_v3 }
  0x52   : > { %v2694_v61 = vpack.c.bf16 %v4298_v38, %v4297_v28  ;;  %v4302_v58 = vand.u32 4294901760, %v3409_v6  ;;  %v4303_v10 = vand.u32 4294901760, %v3414_v55  ;;  %v4304_v36 = vand.u32 4294901760, %v3435_v9  ;;  %517 = vmatmul.mubr.f32.vlgmr.msra.gmra.mrb[0].mxu1 %v3568_v16 }
  0x53   : > { %v2696_v60 = vpack.c.bf16 %v4300_v43, %v4299_v40  ;;  %v4305_v31 = vand.u32 4294901760, %v3447_v11  ;;  %v4306_v32 = vand.u32 4294901760, %v3472_v29  ;;  %v2628_v7 = vpack.c.bf16 %v3325_v47, %v3295_v63  ;;  %2651 = vmatpush3.bf16.msra.mxu1 %v3190_v20  ;;  %759 = vmatprep.mubr.f32.mxu1 %v276_v1  ;;  %v4321_v43 = vld [vmem:[#allocation6_spill] sm:$0xff] }
  0x54   : > { %v2698_v42 = vpack.c.bf16 %v4302_v58, %v4301_v46  ;;  %v2700_v51 = vpack.c.bf16 %v4304_v36, %v4303_v10  ;;  %v4307_v21 = vand.u32 4294901760, %v3511_v23  ;;  %v4308_v25 = vand.u32 4294901760, %v3536_v35  ;;  %2627 = vmatpush3.bf16.msra.mxu0 %v2626_v5  ;;  %2653 = vmatprep.subr.bf16.mxu1 %v3195_v22  ;;  %v4323_v36 = vld [vmem:[#allocation8_spill] sm:$0xff] }
  0x55   : > { %v3683_v15 = vpack.c.bf16 %v4306_v32, %v4305_v31  ;;  %v2630_v3 = vpack.c.bf16 %v3350_v17, %v3330_v50  ;;  %2629 = vmatprep.subr.bf16.mxu0 %v2628_v7  ;;  %v2632_v63 = vpack.c.bf16 %v3376_v59, %v3355_v53  ;;  %v2634_v47 = vpack.c.bf16 %v3409_v6, %v3388_v30  ;;  %v4309_v59 = vld [vmem:[#allocation33_spill] sm:$0xff]  ;;  %v4310_v30 = vld [vmem:[#allocation42_spill] sm:$0xff] }
  0x56   : > { %v3691_v26 = vpack.c.bf16 %v4308_v25, %v4307_v21  ;;  %v2636_v5 = vpack.c.bf16 %v3435_v9, %v3414_v55  ;;  %v2638_v53 = vpack.c.bf16 %v3472_v29, %v3447_v11  ;;  %v2640_v50 = vpack.c.bf16 %v3499_v34, %v3477_v18  ;;  %v4311_v29 = vld [vmem:[#allocation37_spill] sm:$0xff]  ;;  %v4312_v9 = vld [vmem:[#allocation39_spill] sm:$0xff] }
  0x57   : > { %2655 = vmatpush3.bf16.msra.mxu1 %v3214_v27  ;;  %v2642_v55 = vpack.c.bf16 %v3536_v35, %v3511_v23  ;;  %v2644_v6 = vpack.c.bf16 %v3553_v24, %v3541_v2  ;;  %v2646_v17 = vpack.c.bf16 %v3589_v8, %v3560_v0  ;;  %v4313_v11 = vld [vmem:[#allocation41_spill] sm:$0xff]  ;;  %v4314_v35 = vld [vmem:[#allocation40_spill] sm:$0xff]  ;;  %v4315_v23 = vand.u32 4294901760, %v4310_v30 }
  0x58   : > { %2631 = vmatpush3.bf16.msra.mxu0 %v2630_v3  ;;  %2657 = vmatprep.subr.bf16.mxu1 %v3241_v39  ;;  %v4324_v21 = vld [vmem:[#allocation9_spill] sm:$0xff] }
  0x59   : > { %2633 = vmatprep.subr.bf16.mxu0 %v2632_v63  ;;  %v1128_v25 = vsel %vm1069_vm1, %v4324_v21, 0 }
  0x5a   : > { %v1224_v63 = vand.u32 4294901760, %v1128_v25 }
  0x5b   : > { %2659 = vmatpush3.bf16.msra.mxu1 %v3256_v45 }
  0x5c   : > { %2635 = vmatpush3.bf16.msra.mxu0 %v2634_v47  ;;  %2661 = vmatprep.subr.bf16.mxu1 %v3292_v62 }
  0x5d   : > { %2637 = vmatprep.subr.bf16.mxu0 %v2636_v5  ;;  %v4326_v5 = vld [vmem:[#allocation11_spill] sm:$0xff] }
  0x5f   : > { %2663 = vmatpush3.bf16.msra.mxu1 %v3327_v49 }
  0x60   : > { %2639 = vmatpush3.bf16.msra.mxu0 %v2638_v53  ;;  %2665 = vmatprep.subr.bf16.mxu1 %v3352_v54  ;;  %v1080_v53 = vsel %vm1069_vm1, %v4326_v5, 0 }
  0x61   : > { %2641 = vmatprep.subr.bf16.mxu0 %v2640_v50  ;;  %v4327_v50 = vld [vmem:[#allocation12_spill] sm:$0xff] }
  0x63   : > { %2667 = vmatpush3.bf16.msra.mxu1 %v3385_v44 }
  0x64   : > { %2643 = vmatpush3.bf16.msra.mxu0 %v2642_v55  ;;  %2669 = vmatprep.subr.bf16.mxu1 %v3411_v56  ;;  %v1083_v55 = vsel %vm1069_vm1, %v4327_v50, 0  ;;  %v3853_v50 = vsub.f32 %v1128_v25, %v1224_v63 }
  0x65   : > { %2645 = vmatprep.subr.bf16.mxu0 %v2644_v6  ;;  %v1176_v6 = vand.u32 4294901760, %v1080_v53 }
  0x67   : > { %2671 = vmatpush3.bf16.msra.mxu1 %v3444_v37 }
  0x68   : > { %2647 = vmatpush3.bf16.msra.mxu0 %v2646_v17  ;;  %2673 = vmatprep.subr.bf16.mxu1 %v4309_v59  ;;  %v1179_v17 = vand.u32 4294901760, %v1083_v55 }
  0x69   : > { %2681 = vmatprep.subr.bf16.mxu0 %v2680_v57 }
  0x6b   : > { %655 = vmatmul.mubr.f32.vlgmr.msra.gmra.mrb[2].mxu0 %v4310_v30  ;;  %2675 = vmatpush3.bf16.msra.mxu1 %v4311_v29  ;;  %v3803_v30 = vpack.c.bf16 %v1179_v17, %v1176_v6 }
  0x6c   : > { %2683 = vmatpush3.bf16.msra.mxu0 %v2682_v48  ;;  %2677 = vmatprep.subr.bf16.mxu1 %v4312_v9 }
  0x6d   : > { %2685 = vmatprep.subr.bf16.mxu0 %v2684_v52  ;;  %929 = vmatprep.mubr.f32.mxu0 %v4313_v11 }
  0x6f   : > { %2679 = vmatpush3.bf16.msra.mxu1 %v4314_v35 }
  0x70   : > { %2687 = vmatpush3.bf16.msra.mxu0 %v2686_v13  ;;  %2713 = vmatprep.subr.bf16.mxu1 %v3173_v14  ;;  %v4316_v14 = vand.u32 4294901760, %v3477_v18  ;;  %v4319_v18 = vand.u32 4294901760, %v3560_v0 }
  0x71   : > { %2689 = vmatprep.subr.bf16.mxu0 %v2688_v12 }
  0x72   : > { %763 = vmatmul.mubr.f32.vlgmr.msra.gmra.mrb[2].mxu1 %v4315_v23 }
  0x73   : > { %2715 = vmatpush3.bf16.msra.mxu1 %v3190_v20  ;;  %1033 = vmatprep.mubr.f32.mxu1 %v4313_v11  ;;  %v4317_v20 = vand.u32 4294901760, %v3499_v34  ;;  %v4329_v11 = vld [vmem:[#allocation14_spill] sm:$0xff] }
  0x74   : > { %2691 = vmatpush3.bf16.msra.mxu0 %v2690_v41  ;;  %2717 = vmatprep.subr.bf16.mxu1 %v3195_v22  ;;  %v4318_v22 = vand.u32 4294901760, %v3541_v2 }
  0x75   : > { %2693 = vmatprep.subr.bf16.mxu0 %v2692_v4  ;;  %v2704_v1 = vpack.c.bf16 %v4317_v20, %v4316_v14  ;;  %v4330_v20 = vld [vmem:[#allocation15_spill] sm:$0xff] }
  0x77   : > { %2719 = vmatpush3.bf16.msra.mxu1 %v3214_v27  ;;  %v2708_v27 = vpack.c.bf16 %v510_v33, %v4318_v22  ;;  %v4331_v22 = vld [vmem:[#allocation16_spill] sm:$0xff] }
  0x78   : > { %2695 = vmatpush3.bf16.msra.mxu0 %v2694_v61  ;;  %2721 = vmatprep.subr.bf16.mxu1 %v3241_v39  ;;  %v2710_v39 = vpack.c.bf16 %v398_v19, %v4319_v18  ;;  %v4320_v61 = vld [vmem:[#allocation5_spill] sm:$0xff] }
  0x79   : > { %2697 = vmatprep.subr.bf16.mxu0 %v2696_v60  ;;  %v3769_v40 = vsel %vm1069_vm1, %v4320_v61, 0  ;;  %v3773_v60 = vsel %vm1069_vm1, %v4321_v43, 0 }
  0x7a   : > { %v1218_v46 = vand.u32 4294901760, %v3769_v40  ;;  %v1221_v58 = vand.u32 4294901760, %v3773_v60 }
  0x7b   : > { %2723 = vmatpush3.bf16.msra.mxu1 %v3256_v45 }
  0x7c   : > { %2699 = vmatpush3.bf16.msra.mxu0 %v2698_v42  ;;  %2725 = vmatprep.subr.bf16.mxu1 %v3292_v62  ;;  %v4322_v42 = vld [vmem:[#allocation7_spill] sm:$0xff] }
  0x7d   : > { %2701 = vmatprep.subr.bf16.mxu0 %v2700_v51  ;;  %v1074_v10 = vsel %vm1069_vm1, %v4322_v42, 0  ;;  %v1077_v51 = vsel %vm1069_vm1, %v4323_v36, 0 }
  0x7e   : > { %v1170_v31 = vand.u32 4294901760, %v1074_v10  ;;  %v1173_v32 = vand.u32 4294901760, %v1077_v51 }
  0x7f   : > { %2727 = vmatpush3.bf16.msra.mxu1 %v3327_v49 }
  0x80   : > { %2703 = vmatpush3.bf16.msra.mxu0 %v3683_v15  ;;  %2729 = vmatprep.subr.bf16.mxu1 %v3352_v54  ;;  %v3785_v15 = vpack.c.bf16 %v1221_v58, %v1218_v46  ;;  %v3787_v7 = vpack.c.bf16 %v1173_v32, %v1170_v31  ;;  %v3849_v36 = vsub.f32 %v1074_v10, %v1170_v31 }
  0x81   : > { %2705 = vmatprep.subr.bf16.mxu0 %v2704_v1  ;;  %v1086_v1 = vsel %vm1069_vm1, %v4330_v20, 0  ;;  %v3851_v21 = vsub.f32 %v1077_v51, %v1173_v32  ;;  %v3859_v20 = vsub.f32 %v1083_v55, %v1179_v17  ;;  %v4342_v17 = vld [vmem:[#allocation25_spill] sm:$0xff] }
  0x82   : > { %v1182_v18 = vand.u32 4294901760, %v1086_v1 }
  0x83   : > { %2731 = vmatpush3.bf16.msra.mxu1 %v3385_v44 }
  0x84   : > { %2707 = vmatpush3.bf16.msra.mxu0 %v3691_v26  ;;  %2733 = vmatprep.subr.bf16.mxu1 %v3411_v56  ;;  %v4325_v26 = vld [vmem:[#allocation10_spill] sm:$0xff] }
  0x85   : > { %2709 = vmatprep.subr.bf16.mxu0 %v2708_v27  ;;  %v1131_v3 = vsel %vm1069_vm1, %v4325_v26, 0  ;;  %v1089_v27 = vsel %vm1069_vm1, %v4331_v22, 0 }
  0x86   : > { %v1227_v47 = vand.u32 4294901760, %v1131_v3 }
  0x87   : > { %2735 = vmatpush3.bf16.msra.mxu1 %v3444_v37 }
  0x88   : > { %2711 = vmatpush3.bf16.msra.mxu0 %v2710_v39  ;;  %2737 = vmatprep.subr.bf16.mxu1 %v4309_v59  ;;  %v3801_v59 = vpack.c.bf16 %v1227_v47, %v1224_v63  ;;  %v1185_v39 = vand.u32 4294901760, %v1089_v27 }
  0x89   : > { %2841 = vmatprep.subr.bf16.mxu0 %v3785_v15 }
  0x8a   : > { %v3867_v10 = vsub.f32 %v1089_v27, %v1185_v39  ;;  %v4344_v27 = vld [vmem:[#allocation27_spill] sm:$0xff] }
  0x8b   : > { %931 = vmatmul.mubr.f32.vlgmr.msra.gmra.mrb[4].mxu0 %v3568_v16  ;;  %2739 = vmatpush3.bf16.msra.mxu1 %v4311_v29  ;;  %v4328_v29 = vld [vmem:[#allocation13_spill] sm:$0xff] }
  0x8c   : > { %2741 = vmatprep.subr.bf16.mxu1 %v4312_v9  ;;  %v1134_v9 = vsel %vm1069_vm1, %v4328_v29, 0  ;;  %v3855_v29 = vsub.f32 %v1131_v3, %v1227_v47 }
  0x8d   : > { %v1230_v23 = vand.u32 4294901760, %v1134_v9 }
  0x8f   : > { %2743 = vmatpush3.bf16.msra.mxu1 %v4314_v35  ;;  %v1137_v35 = vsel %vm1069_vm1, %v4329_v11, 0  ;;  %v3857_v11 = vsub.f32 %v1080_v53, %v1176_v6  ;;  %v3861_v22 = vsub.f32 %v1134_v9, %v1230_v23  ;;  %v1152_v9 = vsel %vm1069_vm1, %v4342_v17, 0 }
  0x90   : > { %2745 = vmatprep.subr.bf16.mxu1 %v3785_v15  ;;  %v1233_v14 = vand.u32 4294901760, %v1137_v35 }
  0x91   : > { %2843 = vmatpush3.bf16.xpose.msra.mxu0 %v3787_v7 }
  0x92   : > { %1035 = vmatmul.mubr.f32.vlgmr.msra.gmra.mrb[4].mxu1 %v3568_v16  ;;  %2845 = vmatprep.subr.bf16.mxu0 %v3801_v59 }
  0x98   : > { %2747 = vmatpush3.bf16.xpose.msra.mxu1 %v3787_v7 }
  0x99   : > { %2749 = vmatprep.subr.bf16.mxu1 %v3801_v59  ;;  %2847 = vmatpush3.bf16.xpose.msra.mxu0 %v3803_v30 }
  0xa0   : > { %2751 = vmatpush3.bf16.xpose.msra.mxu1 %v3803_v30 }
 0x11e   : > { %v2170_v0 = vpop.f32.mrb[0].mxu0 }
 0x11f   : > { %v2171_v2 = vpop.f32.mrb[1].mxu0 }
 0x120   : > { %v2172_v44 = vadd.f32 %v2171_v2, %v2170_v0  ;;  %v3817_v0 = vpack.c.bf16 %v1233_v14, %v1230_v23  ;;  %v3819_v2 = vpack.c.bf16 %v1185_v39, %v1182_v18  ;;  %v4345_v39 = vld [vmem:[#allocation28_spill] sm:$0xff] }
 0x122   : > { %2849 = vmatprep.subr.bf16.mxu0 %v3817_v0  ;;  %2753 = vmatprep.subr.bf16.mxu1 %v3817_v0 }
 0x123   : > { %2851 = vmatpush3.bf16.xpose.msra.mxu0 %v3819_v2  ;;  %2755 = vmatpush3.bf16.xpose.msra.mxu1 %v3819_v2 }
 0x125   : > { %v2205_v19 = vpop.f32.mrb[0].mxu1 }
 0x126   : > { %v2206_v45 = vpop.f32.mrb[1].mxu1 }
 0x127   : > { %v2207_v54 = vadd.f32 %v2206_v45, %v2205_v19  ;;  %v4333_v45 = vld [vmem:[#allocation18_spill] sm:$0xff] }
 0x129   : > { %v519_v37 = vadd.f32 %v2207_v54, %v2172_v44  ;;  %v4332_v44 = vld [vmem:[#allocation17_spill] sm:$0xff]  ;;  %v1143_v54 = vsel %vm1069_vm1, %v4333_v45, 0  ;;  %v3865_v45 = vsub.f32 %v1086_v1, %v1182_v18  ;;  %v1104_v18 = vsel %vm1069_vm1, %v4344_v27, 0 }
 0x12a   : > { %v1140_v19 = vsel %vm1069_vm1, %v4332_v44, 0  ;;  %v3863_v44 = vsub.f32 %v1137_v35, %v1233_v14  ;;  %v4343_v35 = vld [vmem:[#allocation26_spill] sm:$0xff]  ;;  %v1248_v14 = vand.u32 4294901760, %v1152_v9 }
 0x12b   : > { %v1155_v23 = vsel %vm1069_vm1, %v4343_v35, 0 }
 0x12c   : > { %v1251_v1 = vand.u32 4294901760, %v1155_v23 }
 0x13e   : > { %v2240_v56 = vpop.f32.mrb[2].mxu0 }
 0x13f   : > { %v2241_v62 = vpop.f32.mrb[3].mxu0 }
 0x140   : > { %v2242_v49 = vadd.f32 %v2241_v62, %v2240_v56  ;;  %v1239_v56 = vand.u32 4294901760, %v1143_v54  ;;  %v4334_v62 = vld [vmem:[#allocation19_spill] sm:$0xff] }
 0x142   : > { %v657_v34 = vadd.f32 %v2242_v49, %v519_v37  ;;  %v1236_v37 = vand.u32 4294901760, %v1140_v19  ;;  %v1092_v49 = vsel %vm1069_vm1, %v4334_v62, 0  ;;  %v3871_v31 = vsub.f32 %v1143_v54, %v1239_v56 }
 0x143   : > { %v1200_v54 = vand.u32 4294901760, %v1104_v18 }
 0x144   : > { %v3869_v51 = vsub.f32 %v1140_v19, %v1236_v37  ;;  %v1107_v19 = vsel %vm1069_vm1, %v4345_v39, 0 }
 0x145   : > { %v2275_v24 = vpop.f32.mrb[2].mxu1 }
 0x146   : > { %v2276_v8 = vpop.f32.mrb[3].mxu1 }
 0x147   : > { %v2277_v33 = vadd.f32 %v2276_v8, %v2275_v24  ;;  %v1188_v8 = vand.u32 4294901760, %v1092_v49 }
 0x149   : > { %v765_v57 = vadd.f32 %v2277_v33, %v657_v34  ;;  %v4335_v34 = vld [vmem:[#allocation20_spill] sm:$0xff]  ;;  %v3873_v32 = vsub.f32 %v1092_v49, %v1188_v8  ;;  %v4347_v49 = vld [vmem:[#allocation30_spill] sm:$0xff] }
 0x14a   : > { %v1095_v24 = vsel %vm1069_vm1, %v4335_v34, 0  ;;  %v1161_v34 = vsel %vm1069_vm1, %v4347_v49, 0 }
 0x14b   : > { %v1191_v33 = vand.u32 4294901760, %v1095_v24 }
 0x14d   : > { %v3875_v25 = vsub.f32 %v1095_v24, %v1191_v33  ;;  %v3905_v24 = vpack.c.bf16 %v1251_v1, %v1248_v14 }
 0x14f   : > { %4348 = vst [vmem:[#allocation37_spill] sm:$0xff] %v3905_v24 }
 0x15e   : > { %v2310_v48 = vpop.f32.mrb[4].mxu0 }
 0x15f   : > { %v2311_v52 = vpop.f32.mrb[5].mxu0 }
 0x160   : > { %v2312_v13 = vadd.f32 %v2311_v52, %v2310_v48  ;;  %v3835_v48 = vpack.c.bf16 %v1191_v33, %v1188_v8  ;;  %v4336_v52 = vld [vmem:[#allocation21_spill] sm:$0xff]  ;;  %v3907_v8 = vsub.f32 %v1152_v9, %v1248_v14  ;;  %v3909_v33 = vsub.f32 %v1155_v23, %v1251_v1  ;;  %v4354_v14 = vld [vmem:[#allocation35_spill] sm:$0xff] }
 0x161   : > { %v1167_v1 = vsel %vm1069_vm1, %v4354_v14, 0 }
 0x162   : > { %v933_v12 = vadd.f32 %v2312_v13, %v765_v57  ;;  %v3833_v57 = vpack.c.bf16 %v1239_v56, %v1236_v37  ;;  %v1146_v13 = vsel %vm1069_vm1, %v4336_v52, 0  ;;  %v1203_v37 = vand.u32 4294901760, %v1107_v19  ;;  %v4346_v56 = vld [vmem:[#allocation29_spill] sm:$0xff] }
 0x163   : > { %v1242_v43 = vand.u32 4294901760, %v1146_v13  ;;  %v1158_v62 = vsel %vm1069_vm1, %v4346_v56, 0 }
 0x164   : > { %2853 = vmatprep.subr.bf16.mxu0 %v3833_v57  ;;  %2757 = vmatprep.subr.bf16.mxu1 %v3833_v57  ;;  %v1254_v52 = vand.u32 4294901760, %v1158_v62 }
 0x165   : > { %v2345_v16 = vpop.f32.mrb[4].mxu1  ;;  %2855 = vmatpush3.bf16.xpose.msra.mxu0 %v3835_v48  ;;  %2759 = vmatpush3.bf16.xpose.msra.mxu1 %v3835_v48  ;;  %v3879_v63 = vsub.f32 %v1146_v13, %v1242_v43  ;;  %v3911_v13 = vpack.c.bf16 %v1203_v37, %v1200_v54 }
 0x166   : > { %v2346_v41 = vpop.f32.mrb[5].mxu1 }
 0x167   : > { %v2347_v4 = vadd.f32 %v2346_v41, %v2345_v16  ;;  %v4338_v41 = vld [vmem:[#allocation23_spill] sm:$0xff]  ;;  %4349 = vst [vmem:[#allocation39_spill] sm:$0xff] %v3911_v13 }
 0x169   : > { %v3764_v28 = vadd.f32 %v2347_v4, %v933_v12  ;;  %v4337_v12 = vld [vmem:[#allocation22_spill] sm:$0xff]  ;;  %v1098_v4 = vsel %vm1069_vm1, %v4338_v41, 0  ;;  %v1257_v41 = vand.u32 4294901760, %v1161_v34 }
 0x16a   : > { %v1149_v16 = vsel %vm1069_vm1, %v4337_v12, 0  ;;  %v1194_v26 = vand.u32 4294901760, %v1098_v4  ;;  %v3913_v12 = vsub.f32 %v1104_v18, %v1200_v54  ;;  %v4355_v18 = vld [vmem:[#allocation36_spill] sm:$0xff] }
 0x16b   : > { %v1041_v38 = vsel %vm1040_vm0, %v3764_v28, 0.0  ;;  %v1245_v42 = vand.u32 4294901760, %v1149_v16  ;;  %v3927_v17 = vpack.c.bf16 %v1257_v41, %v1254_v52  ;;  %v3929_v9 = vsub.f32 %v1161_v34, %v1257_v41 }
 0x16c   : > { %1042 = vadd.xlane.f32.xlu0 %v1041_v38  ;;  %v4339_v38 = vld [vmem:[#allocation24_spill] sm:$0xff]  ;;  %v3885_v55 = vsub.f32 %v1098_v4, %v1194_v26  ;;  %v3919_v4 = vsub.f32 %v1158_v62, %v1254_v52  ;;  %v1116_v39 = vsel %vm1069_vm1, %v4355_v18, 0  ;;  %v1263_v62 = vand.u32 4294901760, %v1167_v1 }
 0x16d   : > { %v1101_v61 = vsel %vm1069_vm1, %v4339_v38, 0  ;;  %v3877_v3 = vpack.c.bf16 %v1245_v42, %v1242_v43  ;;  %v3881_v47 = vsub.f32 %v1149_v16, %v1245_v42  ;;  %v3915_v16 = vsub.f32 %v1107_v19, %v1203_v37  ;;  %v4350_v38 = vld [vmem:[#allocation31_spill] sm:$0xff]  ;;  %v4351_v43 = vld [vmem:[#allocation32_spill] sm:$0xff]  ;;  %4353 = vst [vmem:[#allocation41_spill] sm:$0xff] %v3927_v17  ;;  %v4356_v19 = vld [vmem:[#allocation38_spill] sm:$0xff] }
 0x16e   : > { %v1197_v5 = vand.u32 4294901760, %v1101_v61  ;;  %v1113_v42 = vsel %vm1069_vm1, %v4351_v43, 0  ;;  %v1119_v54 = vsel %vm1069_vm1, %v4356_v19, 0  ;;  %v1212_v34 = vand.u32 4294901760, %v1116_v39 }
 0x16f   : > { %4340 = vst [vmem:[#allocation33_spill] sm:$0xff] %v3877_v3  ;;  %2857 = vmatprep.subr.bf16.mxu0 %v3877_v3  ;;  %2761 = vmatprep.subr.bf16.mxu1 %v3877_v3  ;;  %v1209_v23 = vand.u32 4294901760, %v1113_v42  ;;  %v1215_v52 = vand.u32 4294901760, %v1119_v54  ;;  %v3945_v41 = vsub.f32 %v1167_v1, %v1263_v62  ;;  %v1448_v3 = vand.u32 4294901760, %v3879_v63 }
 0x170   : > { %v3883_v53 = vpack.c.bf16 %v1197_v5, %v1194_v26  ;;  %v3887_v6 = vsub.f32 %v1101_v61, %v1197_v5  ;;  %v1110_v61 = vsel %vm1069_vm1, %v4350_v38, 0  ;;  %v4352_v26 = vld [vmem:[#allocation34_spill] sm:$0xff]  ;;  %v3949_v38 = vsub.f32 %v1116_v39, %v1212_v34 }
 0x171   : > { %v1164_v5 = vsel %vm1069_vm1, %v4352_v26, 0  ;;  %v1206_v35 = vand.u32 4294901760, %v1110_v61  ;;  %v3939_v56 = vsub.f32 %v1113_v42, %v1209_v23  ;;  %v3964_v26 = vsub.f32 %v3769_v40, %v1218_v46 }
 0x172   : > { %4341 = vst [vmem:[#allocation42_spill] sm:$0xff] %v3883_v53  ;;  %2859 = vmatpush3.bf16.xpose.msra.mxu0 %v3883_v53  ;;  %2763 = vmatpush3.bf16.xpose.msra.mxu1 %v3883_v53  ;;  %v1260_v27 = vand.u32 4294901760, %v1164_v5 }
 0x173   : > { %2861 = vmatprep.subr.bf16.mxu0 %v3905_v24  ;;  %2765 = vmatprep.subr.bf16.mxu1 %v3905_v24  ;;  %v3937_v37 = vsub.f32 %v1110_v61, %v1206_v35  ;;  %v3951_v61 = vsub.f32 %v1119_v54, %v1215_v52  ;;  %v3953_v43 = vpack.c.bf16 %v1209_v23, %v1206_v35  ;;  %v1392_v23 = vand.u32 4294901760, %v3964_v26 }
 0x174   : > { %v3941_v49 = vsub.f32 %v1164_v5, %v1260_v27  ;;  %v3955_v42 = vpack.c.bf16 %v1263_v62, %v1260_v27  ;;  %v3969_v5 = vsub.f32 %v3773_v60, %v1221_v58  ;;  %v3971_v35 = vpack.c.bf16 %v1215_v52, %v1212_v34 }
 0x175   : > { %4357 = vst [vmem:[#allocation40_spill] sm:$0xff] %v3953_v43  ;;  %v1393_v27 = vsub.f32 %v3964_v26, %v1392_v23  ;;  %v1427_v24 = vand.u32 4294901760, %v3863_v44 }
 0x176   : > { %4358 = vst [vmem:[#allocation5_spill] sm:$0xff] %v3955_v42  ;;  %4359 = vst [vmem:[#allocation6_spill] sm:$0xff] %v3971_v35  ;;  %v1399_v14 = vand.u32 4294901760, %v3969_v5 }
 0x177   : > { %v1394_v46 = vand.u32 4294901760, %v1393_v27 }
 0x178   : > { %v2872_v1 = vpack.c.bf16 %v1399_v14, %v1392_v23  ;;  %v1400_v40 = vsub.f32 %v3969_v5, %v1399_v14 }
 0x17a   : > { %2863 = vmatpush3.bf16.xpose.msra.mxu0 %v3911_v13  ;;  %2767 = vmatpush3.bf16.xpose.msra.mxu1 %v3911_v13  ;;  %v1401_v18 = vand.u32 4294901760, %v1400_v40  ;;  %v1420_v13 = vand.u32 4294901760, %v3861_v22 }
 0x17b   : > { %2865 = vmatprep.subr.bf16.mxu0 %v3927_v17  ;;  %2769 = vmatprep.subr.bf16.mxu1 %v3927_v17 }
 0x17c   : > { %v2776_v60 = vpack.c.bf16 %v1401_v18, %v1394_v46 }
 0x182   : > { %2867 = vmatpush3.bf16.xpose.msra.mxu0 %v3953_v43  ;;  %2771 = vmatpush3.bf16.xpose.msra.mxu1 %v3953_v43 }
 0x183   : > { %2869 = vmatprep.subr.bf16.mxu0 %v3955_v42  ;;  %2773 = vmatprep.subr.bf16.mxu1 %v3955_v42 }
 0x18a   : > { %2871 = vmatpush3.bf16.xpose.msra.mxu0 %v3971_v35  ;;  %2775 = vmatpush3.bf16.xpose.msra.mxu1 %v3971_v35  ;;  %v1287_v35 = vand.u32 4294901760, %v3851_v21 }
 0x18b   : > { %2873 = vmatprep.subr.bf16.mxu0 %v2872_v1  ;;  %2777 = vmatprep.subr.bf16.mxu1 %v2776_v60 }
 0x1f9   : > { %v1043_v58 = vpop.xlane.xlu0 %1042 }
 0x1fa   : > { %v2129_v39 = vmul.f32 -0.00390625, %v1043_v58 }
 0x1fc   : > { %v1046_v19 = vmul.f32 1.442695, %v2129_v39 }
 0x1fe   : > { %2989 = vpow2.f32 %v1046_v19 }
 0x208   : > { %v2990_v54 = vpop.eup %2989 }
 0x209   : > { %v1048_v62 = vadd.f32 1.0, %v2990_v54 }
 0x20b   : > { %2991 = vrcp.f32 %v1048_v62  ;;  %v1280_v62 = vand.u32 4294901760, %v3849_v36 }
 0x215   : > { %v2992_v34 = vpop.eup %2991 }
 0x216   : > { %v3979_v52 = vmul.f32 2.0, %v2992_v34 }
 0x218   : > { %4360 = vst [vmem:[#allocation7_spill] sm:$0xff] %v3979_v52  ;;  %v1052_v23 = vmul.f32 %v3979_v52, %v3764_v28  ;;  %v1406_v28 = vand.u32 4294901760, %v3853_v50  ;;  %v1301_v52 = vand.u32 4294901760, %v3859_v20 }
 0x21a   : > { %v1054_v14 = vsel %vm1053_vm2, %v1052_v23, 0.0  ;;  %v1413_v23 = vand.u32 4294901760, %v3855_v29 }
 0x21b   : > { %v1055_v1 = vrot.slane %v1054_v14, 4 }
 0x21d   : > { %v1056_v27 = vadd.f32 %v1055_v1, %v1054_v14  ;;  %v1281_v1 = vsub.f32 %v3849_v36, %v1280_v62 }
 0x21f   : > { %v1057_v40 = vrot.slane %v1056_v27, 2 }
 0x221   : > { %v1058_v46 = vadd.f32 %v1057_v40, %v1056_v27  ;;  %v1288_v40 = vsub.f32 %v3851_v21, %v1287_v35 }
 0x223   : > { %v1059_v18 = vrot.slane %v1058_v46, 1 }
 0x225   : > { %v1060_v60 = vadd.f32 %v1059_v18, %v1058_v46  ;;  %v1407_v46 = vsub.f32 %v3853_v50, %v1406_v28  ;;  %v1414_v18 = vsub.f32 %v3855_v29, %v1413_v23 }
 0x227   : > { %v2130_v58 = vmul.f32 -0.015625, %v1060_v60  ;;  %v1408_v43 = vand.u32 4294901760, %v1407_v46  ;;  %v1415_v17 = vand.u32 4294901760, %v1414_v18  ;;  %v1428_v46 = vsub.f32 %v3863_v44, %v1427_v24 }
 0x229   : > { %v1063_v39 = vmul.f32 1.442695, %v2130_v58  ;;  %v2874_v58 = vpack.c.bf16 %v1287_v35, %v1280_v62 }
 0x22b   : > { %2993 = vpow2.f32 %v1063_v39  ;;  %v1282_v39 = vand.u32 4294901760, %v1281_v1 }
 0x235   : > { %v2994_v19 = vpop.eup %2993 }
 0x236   : > { %v1065_v54 = vadd.f32 1.0, %v2994_v19  ;;  %v1294_v19 = vand.u32 4294901760, %v3857_v11 }
 0x238   : > { %2995 = vrcp.f32 %v1065_v54  ;;  %v1295_v35 = vsub.f32 %v3857_v11, %v1294_v19  ;;  %v2878_v18 = vpack.c.bf16 %v1301_v52, %v1294_v19 }
 0x23a   : > { %v1296_v53 = vand.u32 4294901760, %v1295_v35 }
 0x242   : > { %v2996_v34 = vpop.eup %2995 }
 0x243   : > { %v1068_v42 = vmul.f32 2.0, %v2996_v34  ;;  %v2876_v34 = vpack.c.bf16 %v1413_v23, %v1406_v28  ;;  %v1302_v28 = vsub.f32 %v3859_v20, %v1301_v52  ;;  %v2780_v23 = vpack.c.bf16 %v1415_v17, %v1408_v43 }
 0x244   : > { %v1429_v17 = vand.u32 4294901760, %v1428_v46  ;;  %v1434_v43 = vand.u32 4294901760, %v3869_v51 }
 0x245   : > { %v1071_v14 = vsel %vm1069_vm1, %v1068_v42, 0  ;;  %v1289_v42 = vand.u32 4294901760, %v1288_v40  ;;  %v1421_v40 = vsub.f32 %v3861_v22, %v1420_v13 }
 0x246   : > { %v3989_v27 = vand.u32 4294901760, %v1071_v14 }
 0x247   : > { %v2778_v1 = vpack.c.bf16 %v1289_v42, %v1282_v39  ;;  %v1315_v39 = vand.u32 4294901760, %v3867_v10  ;;  %v1422_v42 = vand.u32 4294901760, %v1421_v40 }
 0x248   : > { %v3995_v60 = vsub.f32 %v1071_v14, %v3989_v27 }
 0x249   : > { %v1316_v19 = vsub.f32 %v3867_v10, %v1315_v39  ;;  %v2784_v35 = vpack.c.bf16 %v1429_v17, %v1422_v42 }
 0x24a   : > { %v1268_v54 = vand.u32 4294901760, %v3995_v60 }
 0x24b   : > { %v1317_v40 = vand.u32 4294901760, %v1316_v19 }
 0x24c   : > { %2482 = vmatprep.mubr.f32.mxu0 %v1268_v54  ;;  %v1269_v14 = vsub.f32 %v3995_v60, %v1268_v54 }
 0x24d   : > { %2483 = vmatmul.mubr.f32.vlgmr.msra.gmra.mrb[6].mxu0 %v1268_v54  ;;  %v2880_v54 = vpack.c.bf16 %v1427_v24, %v1420_v13  ;;  %v1435_v24 = vsub.f32 %v3869_v51, %v1434_v43 }
 0x24e   : > { %2875 = vmatpush3.bf16.xpose.msra.mxu0 %v2874_v58  ;;  %2516 = vmatprep.mubr.f32.mxu0 %v3989_v27  ;;  %v1270_v62 = vand.u32 4294901760, %v1269_v14  ;;  %v1303_v58 = vand.u32 4294901760, %v1302_v28  ;;  %v1308_v14 = vand.u32 4294901760, %v3865_v45  ;;  %v1322_v28 = vand.u32 4294901760, %v3873_v32 }
 0x24f   : > { %2877 = vmatprep.subr.bf16.mxu0 %v2876_v34  ;;  %v1441_v34 = vand.u32 4294901760, %v3871_v31 }
 0x250   : > { %2380 = vmatprep.mubr.f32.mxu1 %v1270_v62  ;;  %v1309_v52 = vsub.f32 %v3865_v45, %v1308_v14  ;;  %v1323_v42 = vsub.f32 %v3873_v32, %v1322_v28 }
 0x251   : > { %2381 = vmatmul.mubr.f32.vlgmr.msra.gmra.mrb[6].mxu1 %v1270_v62  ;;  %v2782_v62 = vpack.c.bf16 %v1303_v58, %v1296_v53  ;;  %v1442_v13 = vsub.f32 %v3871_v31, %v1441_v34  ;;  %v2884_v46 = vpack.c.bf16 %v1441_v34, %v1434_v43  ;;  %v1436_v53 = vand.u32 4294901760, %v1435_v24 }
 0x252   : > { %2779 = vmatpush3.bf16.xpose.msra.mxu1 %v2778_v1  ;;  %2414 = vmatprep.mubr.f32.mxu1 %v3989_v27  ;;  %v2882_v1 = vpack.c.bf16 %v1315_v39, %v1308_v14  ;;  %v1336_v24 = vand.u32 4294901760, %v3885_v55 }
 0x253   : > { %2781 = vmatprep.subr.bf16.mxu1 %v2780_v23  ;;  %v1310_v23 = vand.u32 4294901760, %v1309_v52  ;;  %v1443_v58 = vand.u32 4294901760, %v1442_v13  ;;  %v1324_v52 = vand.u32 4294901760, %v1323_v42  ;;  %v1343_v13 = vand.u32 4294901760, %v3887_v6 }
 0x255   : > { %v2786_v17 = vpack.c.bf16 %v1317_v40, %v1310_v23  ;;  %v2788_v39 = vpack.c.bf16 %v1443_v58, %v1436_v53  ;;  %v1462_v40 = vand.u32 4294901760, %v3907_v8  ;;  %v1337_v58 = vsub.f32 %v3885_v55, %v1336_v24 }
 0x256   : > { %2879 = vmatpush3.bf16.xpose.msra.mxu0 %v2878_v18  ;;  %v1329_v18 = vand.u32 4294901760, %v3875_v25  ;;  %v2890_v42 = vpack.c.bf16 %v1343_v13, %v1336_v24 }
 0x257   : > { %2881 = vmatprep.subr.bf16.mxu0 %v2880_v54  ;;  %v1455_v54 = vand.u32 4294901760, %v3881_v47 }
 0x258   : > { %v1330_v14 = vsub.f32 %v3875_v25, %v1329_v18  ;;  %v2886_v34 = vpack.c.bf16 %v1329_v18, %v1322_v28  ;;  %v1344_v28 = vsub.f32 %v3887_v6, %v1343_v13 }
 0x259   : > { %v1456_v43 = vsub.f32 %v3881_v47, %v1455_v54 }
 0x25a   : > { %2783 = vmatpush3.bf16.xpose.msra.mxu1 %v2782_v62  ;;  %v1449_v62 = vsub.f32 %v3879_v63, %v1448_v3  ;;  %v1331_v19 = vand.u32 4294901760, %v1330_v14  ;;  %v1338_v14 = vand.u32 4294901760, %v1337_v58 }
 0x25b   : > { %2785 = vmatprep.subr.bf16.mxu1 %v2784_v35  ;;  %v2888_v35 = vpack.c.bf16 %v1455_v54, %v1448_v3  ;;  %v1457_v23 = vand.u32 4294901760, %v1456_v43  ;;  %v1463_v3 = vsub.f32 %v3907_v8, %v1462_v40  ;;  %v1357_v43 = vand.u32 4294901760, %v3915_v16 }
 0x25c   : > { %v2790_v53 = vpack.c.bf16 %v1331_v19, %v1324_v52  ;;  %v1476_v19 = vand.u32 4294901760, %v3919_v4 }
 0x25d   : > { %v1358_v24 = vsub.f32 %v3915_v16, %v1357_v43 }
 0x25e   : > { %2883 = vmatpush3.bf16.xpose.msra.mxu0 %v2882_v1  ;;  %v1450_v1 = vand.u32 4294901760, %v1449_v62 }
 0x25f   : > { %2885 = vmatprep.subr.bf16.mxu0 %v2884_v46  ;;  %v1469_v46 = vand.u32 4294901760, %v3909_v33 }
 0x260   : > { %v2792_v18 = vpack.c.bf16 %v1457_v23, %v1450_v1 }
 0x261   : > { %v1470_v54 = vsub.f32 %v3909_v33, %v1469_v46  ;;  %v2892_v62 = vpack.c.bf16 %v1469_v46, %v1462_v40 }
 0x262   : > { %2787 = vmatpush3.bf16.xpose.msra.mxu1 %v2786_v17  ;;  %v1350_v17 = vand.u32 4294901760, %v3913_v12 }
 0x263   : > { %2789 = vmatprep.subr.bf16.mxu1 %v2788_v39  ;;  %v1345_v39 = vand.u32 4294901760, %v1344_v28  ;;  %v1471_v52 = vand.u32 4294901760, %v1470_v54  ;;  %v1359_v28 = vand.u32 4294901760, %v1358_v24  ;;  %v1371_v54 = vand.u32 4294901760, %v3939_v56 }
 0x264   : > { %v1351_v1 = vsub.f32 %v3913_v12, %v1350_v17  ;;  %v2894_v46 = vpack.c.bf16 %v1357_v43, %v1350_v17 }
 0x265   : > { %v2794_v23 = vpack.c.bf16 %v1345_v39, %v1338_v14  ;;  %v1490_v39 = vand.u32 4294901760, %v3941_v49  ;;  %v1372_v17 = vsub.f32 %v3939_v56, %v1371_v54 }
 0x266   : > { %2887 = vmatpush3.bf16.xpose.msra.mxu0 %v2886_v34  ;;  %v1464_v34 = vand.u32 4294901760, %v1463_v3  ;;  %v1352_v58 = vand.u32 4294901760, %v1351_v1  ;;  %v1364_v3 = vand.u32 4294901760, %v3937_v37 }
 0x267   : > { %2889 = vmatprep.subr.bf16.mxu0 %v2888_v35  ;;  %v1483_v35 = vand.u32 4294901760, %v3929_v9  ;;  %v1373_v24 = vand.u32 4294901760, %v1372_v17  ;;  %v2812_v17 = vpack.c.bf16 %v3855_v29, %v3853_v50  ;;  %v4363_v50 = vld [vmem:[#allocation37_spill] sm:$0xff]  ;;  %v4364_v29 = vld [vmem:[#allocation39_spill] sm:$0xff] }
 0x268   : > { %v2796_v13 = vpack.c.bf16 %v1471_v52, %v1464_v34  ;;  %v2798_v34 = vpack.c.bf16 %v1359_v28, %v1352_v58  ;;  %v1365_v52 = vsub.f32 %v3937_v37, %v1364_v3  ;;  %v2898_v1 = vpack.c.bf16 %v1371_v54, %v1364_v3 }
 0x269   : > { %v1484_v40 = vsub.f32 %v3929_v9, %v1483_v35 }
 0x26a   : > { %2791 = vmatpush3.bf16.xpose.msra.mxu1 %v2790_v53  ;;  %v1477_v53 = vsub.f32 %v3919_v4, %v1476_v19 }
 0x26b   : > { %2793 = vmatprep.subr.bf16.mxu1 %v2792_v18  ;;  %v2896_v18 = vpack.c.bf16 %v1483_v35, %v1476_v19  ;;  %v1485_v14 = vand.u32 4294901760, %v1484_v40  ;;  %v1491_v19 = vsub.f32 %v3941_v49, %v1490_v39 }
 0x26e   : > { %2891 = vmatpush3.bf16.xpose.msra.mxu0 %v2890_v42  ;;  %v1478_v42 = vand.u32 4294901760, %v1477_v53  ;;  %v1385_v53 = vand.u32 4294901760, %v3951_v61 }
 0x26f   : > { %2893 = vmatprep.subr.bf16.mxu0 %v2892_v62  ;;  %v1497_v62 = vand.u32 4294901760, %v3945_v41 }
 0x270   : > { %v2800_v43 = vpack.c.bf16 %v1485_v14, %v1478_v42  ;;  %v1386_v42 = vsub.f32 %v3951_v61, %v1385_v53 }
 0x271   : > { %v1498_v35 = vsub.f32 %v3945_v41, %v1497_v62  ;;  %v2900_v40 = vpack.c.bf16 %v1497_v62, %v1490_v39  ;;  %v2808_v39 = vpack.c.bf16 %v3969_v5, %v3964_v26  ;;  %v2810_v62 = vpack.c.bf16 %v3851_v21, %v3849_v36  ;;  %v4361_v36 = vld [vmem:[#allocation33_spill] sm:$0xff]  ;;  %v4362_v21 = vld [vmem:[#allocation42_spill] sm:$0xff] }
 0x272   : > { %2795 = vmatpush3.bf16.xpose.msra.mxu1 %v2794_v23  ;;  %v1366_v23 = vand.u32 4294901760, %v1365_v52 }
 0x273   : > { %2797 = vmatprep.subr.bf16.mxu1 %v2796_v13  ;;  %v1378_v13 = vand.u32 4294901760, %v3949_v38  ;;  %v1499_v58 = vand.u32 4294901760, %v1498_v35 }
 0x274   : > { %v2802_v28 = vpack.c.bf16 %v1373_v24, %v1366_v23 }
 0x275   : > { %v2902_v3 = vpack.c.bf16 %v1385_v53, %v1378_v13 }
 0x276   : > { %2895 = vmatpush3.bf16.xpose.msra.mxu0 %v2894_v46  ;;  %v1492_v46 = vand.u32 4294901760, %v1491_v19 }
 0x277   : > { %2897 = vmatprep.subr.bf16.mxu0 %v2896_v18  ;;  %v1379_v18 = vsub.f32 %v3949_v38, %v1378_v13 }
 0x278   : > { %v2804_v14 = vpack.c.bf16 %v1499_v58, %v1492_v46 }
 0x279   : > { %v1380_v54 = vand.u32 4294901760, %v1379_v18 }
 0x27a   : > { %2799 = vmatpush3.bf16.xpose.msra.mxu1 %v2798_v34  ;;  %v1387_v34 = vand.u32 4294901760, %v1386_v42 }
 0x27b   : > { %2801 = vmatprep.subr.bf16.mxu1 %v2800_v43 }
 0x27c   : > { %v2806_v52 = vpack.c.bf16 %v1387_v34, %v1380_v54 }
 0x27e   : > { %2899 = vmatpush3.bf16.xpose.msra.mxu0 %v2898_v1 }
 0x27f   : > { %2901 = vmatprep.subr.bf16.mxu0 %v2900_v40 }
 0x282   : > { %2803 = vmatpush3.bf16.xpose.msra.mxu1 %v2802_v28 }
 0x283   : > { %2805 = vmatprep.subr.bf16.mxu1 %v2804_v14 }
 0x286   : > { %2903 = vmatpush3.bf16.xpose.msra.mxu0 %v2902_v3 }
 0x287   : > { %2905 = vmatprep.subr.bf16.mxu0 %v3785_v15  ;;  %v2814_v15 = vpack.c.bf16 %v3859_v20, %v3857_v11  ;;  %v2830_v11 = vpack.c.bf16 %v3915_v16, %v3913_v12  ;;  %v4365_v20 = vld [vmem:[#allocation41_spill] sm:$0xff] }
 0x28a   : > { %2807 = vmatpush3.bf16.xpose.msra.mxu1 %v2806_v52 }
 0x28b   : > { %2809 = vmatprep.subr.bf16.mxu1 %v2808_v39 }
 0x28d   : > { %2517 = vmatmul.mubr.f32.vlgmr.msra.gmra.mrb[6].mxu0 %v3989_v27 }
 0x28e   : > { %2907 = vmatpush3.bf16.xpose.msra.mxu0 %v3787_v7  ;;  %2550 = vmatprep.mubr.f32.mxu0 %v3989_v27  ;;  %v2816_v7 = vpack.c.bf16 %v3863_v44, %v3861_v22  ;;  %v2832_v22 = vpack.c.bf16 %v3929_v9, %v3919_v4  ;;  %v4366_v44 = vld [vmem:[#allocation40_spill] sm:$0xff] }
 0x28f   : > { %2909 = vmatprep.subr.bf16.mxu0 %v3801_v59  ;;  %v2818_v59 = vpack.c.bf16 %v3867_v10, %v3865_v45  ;;  %v2834_v45 = vpack.c.bf16 %v3939_v56, %v3937_v37  ;;  %v4367_v10 = vld [vmem:[#allocation5_spill] sm:$0xff] }
 0x291   : > { %2415 = vmatmul.mubr.f32.vlgmr.msra.gmra.mrb[6].mxu1 %v3989_v27 }
 0x292   : > { %2811 = vmatpush3.bf16.xpose.msra.mxu1 %v2810_v62  ;;  %2448 = vmatprep.mubr.f32.mxu1 %v3995_v60 }
 0x293   : > { %2813 = vmatprep.subr.bf16.mxu1 %v2812_v17 }
 0x296   : > { %2911 = vmatpush3.bf16.xpose.msra.mxu0 %v3803_v30  ;;  %v2820_v30 = vpack.c.bf16 %v3871_v31, %v3869_v51  ;;  %v2836_v51 = vpack.c.bf16 %v3945_v41, %v3941_v49  ;;  %v4368_v31 = vld [vmem:[#allocation6_spill] sm:$0xff] }
 0x297   : > { %2913 = vmatprep.subr.bf16.mxu0 %v3817_v0  ;;  %v2822_v0 = vpack.c.bf16 %v3875_v25, %v3873_v32  ;;  %v2838_v32 = vpack.c.bf16 %v3951_v61, %v3949_v38  ;;  %v3062_v25 = vmov 839922192   ;;  %v4369_v38 = vld [vmem:[#allocation7_spill] sm:$0xff] }
 0x29a   : > { %2815 = vmatpush3.bf16.xpose.msra.mxu1 %v2814_v15 }
 0x29b   : > { %2817 = vmatprep.subr.bf16.mxu1 %v2816_v7 }
 0x29e   : > { %2915 = vmatpush3.bf16.xpose.msra.mxu0 %v3819_v2  ;;  %v2824_v2 = vpack.c.bf16 %v3881_v47, %v3879_v63  ;;  %v2026_v63 = vunpack.c.l.s4 %v3062_v25  ;;  %v2028_v47 = vlaneseq }
 0x29f   : > { %2917 = vmatprep.subr.bf16.mxu0 %v3833_v57  ;;  %v2826_v57 = vpack.c.bf16 %v3887_v6, %v3885_v55 }
 0x2a0   : > { %v2027_v6 = vunpack.c.0.s8 %v2026_v63 }
 0x2a2   : > { %2819 = vmatpush3.bf16.xpose.msra.mxu1 %v2818_v59 }
 0x2a3   : > { %2821 = vmatprep.subr.bf16.mxu1 %v2820_v30 }
 0x2a6   : > { %2919 = vmatpush3.bf16.xpose.msra.mxu0 %v3835_v48  ;;  %v2828_v48 = vpack.c.bf16 %v3909_v33, %v3907_v8  ;;  %v2029_v8 = vshrl.u32 %v2028_v47, 7 }
 0x2a7   : > { %2921 = vmatprep.subr.bf16.mxu0 %v4361_v36 }
 0x2a8   : > { %v2030_v16 = vsub.s32 %v2027_v6, %v2029_v8  ;;  %v2036_v9 = vsub.s32 0, %v2029_v8 }
 0x2aa   : > { %2823 = vmatpush3.bf16.xpose.msra.mxu1 %v2822_v0  ;;  %v2031_v61 = vrot.slane %v4369_v38, %v2030_v16 }
 0x2ab   : > { %2825 = vmatprep.subr.bf16.mxu1 %v2824_v2 }
 0x2ae   : > { %2923 = vmatpush3.bf16.xpose.msra.mxu0 %v4362_v21 }
 0x2af   : > { %2925 = vmatprep.subr.bf16.mxu0 %v4363_v50 }
 0x2b2   : > { %2827 = vmatpush3.bf16.xpose.msra.mxu1 %v2826_v57 }
 0x2b3   : > { %2829 = vmatprep.subr.bf16.mxu1 %v2828_v48 }
 0x2b6   : > { %2927 = vmatpush3.bf16.xpose.msra.mxu0 %v4364_v29 }
 0x2b7   : > { %2929 = vmatprep.subr.bf16.mxu0 %v4365_v20 }
 0x2ba   : > { %2831 = vmatpush3.bf16.xpose.msra.mxu1 %v2830_v11 }
 0x2bb   : > { %2833 = vmatprep.subr.bf16.mxu1 %v2832_v22 }
 0x2be   : > { %2931 = vmatpush3.bf16.xpose.msra.mxu0 %v4366_v44 }
 0x2bf   : > { %2933 = vmatprep.subr.bf16.mxu0 %v4367_v10 }
 0x2c2   : > { %2835 = vmatpush3.bf16.xpose.msra.mxu1 %v2834_v45 }
 0x2c3   : > { %2837 = vmatprep.subr.bf16.mxu1 %v2836_v51 }
 0x2c6   : > { %2935 = vmatpush3.bf16.xpose.msra.mxu0 %v4368_v31 }
 0x2ca   : > { %2839 = vmatpush3.bf16.xpose.msra.mxu1 %v2838_v32 }
 0x2cd   : > { %2551 = vmatmul.mubr.f32.vlgmr.msra.gmra.mrb[6].mxu0 %v3989_v27 }
 0x2d1   : > { %2449 = vmatmul.mubr.f32.vlgmr.msra.gmra.mrb[6].mxu1 %v3995_v60  ;;  %v2997_v60 = vld [vmem:[%s3529_s4] sm:$0xff] }
 0x2d2   : > { %v2033_v43 = vmul.f32 %v2997_v60, %v2031_v61 }
 0x3a0   : > { %v2019_v55 = vpop.f32.mrb[6].mxu0 }
 0x3a1   : > { %v2021_v33 = vpop.f32.mrb[7].mxu0 }
 0x3a4   : > { %v1641_v12 = vpop.f32.mrb[6].mxu1 }
 0x3a5   : > { %v2936_v4 = vadd.f32 1.0, %v1641_v12  ;;  %v1643_v37 = vpop.f32.mrb[7].mxu1 }
 0x3a6   : > { %v2938_v56 = vadd.f32 1.0, %v1643_v37 }
 0x3a7   : > { %v2937_v49 = vadd.f32 %v2936_v4, %v2019_v55 }
 0x3a8   : > { %v2939_v41 = vadd.f32 %v2938_v56, %v2021_v33 }
 0x3a9   : > { %v2037_v26 = vrot.slane %v2937_v49, %v2036_v9 }
 0x3aa   : > { %v2041_v5 = vrot.slane %v2939_v41, %v2036_v9 }
 0x3ac   : > { %v2044_v27 = vcombine.low %v2037_v26, %v2041_v5 }
 0x3ae   : > { %v2046_v19 = vmul.f32 %v2044_v27, %v2033_v43 }
 0x3b0   : > { %2047 = vst [vmem:[%s136_s8] sm:$0xff] %v2046_v19 }
 0x3b1   : > { %3011 = shalt.err (!%p3008_p3)
}
 0x3b2   : > { %s3012_s26 = scalar_lea.hbm %s4114_s21, 128  ;;  %s3016_s29 = scalar_lea.hbm %s4158_s2, 256 }
 0x3b3   : > { %p3013_p4 = scmp.ne.s32.totalorder %s4114_s21, %s3012_s26  ;;  %p3017_p9 = scmp.lt.u32.totalorder %s4114_s21, %s4158_s2 }
 0x3b4   : > { %p3018_p10 = scmp.lt.u32.totalorder %s3016_s29, %s3012_s26  ;;  %p3020_p12 = scmp.lt.u32.totalorder %s3012_s26, %s4114_s21 }
 0x3b5   : > { %p3014_p7 = pnand %p3013_p4, %p3117_p5 }
 0x3b6   : > { %p3019_p11 = por %p3018_p10, %p3017_p9 }
 0x3b7   : > { %p3015_p8 = pneg %p3014_p7 }
 0x3b8   : > { %p3021_p13 = por %p3020_p12, %p3019_p11 }
 0x3ba   : > { %p3022_p0 = pnand %p3021_p13, %p3015_p8 }
 0x3bc   : > { %3025 = shalt.err (!%p3022_p0)
}
 0x3bd   : > { %2948 = dma.vmem_to_hbm [thread:$0]  (%p3117_p5), %s4116_s14, 128, %s4114_s21, %s2049_s22  }
 0x3be PF: > { %p2954_p1 = scmp.ge.s32.totalorder %s3060_s12, 2  ;;  %s2075_s4 = sand.u32 1, %s3048_s9  }
 0x3bf   : > { %s2076_s5 = scalar_lea.sflag [#allocation3], %s2075_s4 }
 0x3c0   : > { %p2951_p2 = pnand %p2954_p1, %p3121_p6 }
 0x3c2   : > { %3043 = dma.done.wait (!%p2951_p2), %s2076_s5, 128  }
 0x3c3   : > { %3045 = vsyncadd (!%p2951_p2), %s2076_s5, 4294967168  ;;  %p12_p3 = scmp.ge.s32.totalorder %s3104_s15, 4   ;;  %s4370_s9 = smov %s3052_s10 }
 0x3c4   : > { %s4371_s10 = smov %s3056_s11  ;;  %s4372_s11 = smov %s3115_s18 }
 0x3c5   : > { %s4373_s12 = smov %s3104_s15  ;;  %14 = sbr.rel (!%p12_p3) target bundleno = 3 (0x3), region = 63 }
 0x3cc   :  { %2081 = vsyncpa [#allocation3], 1 }
 0x3cd   :  { %2083 = vsyncpa [#allocation3 + $0x1], 1 }

</bundles_post_ra>
